<compile_context>
chip_gen: v6e
topology: v6e:2x2x1
jax: 0.10.0
libtpu: 0.0.40
codegen_flags: <defaults>
</compile_context>

<pallas_src>
import functools

import jax
import jax.numpy as jnp
from jax import lax
from jax.experimental import pallas as pl
from jax.experimental.pallas import tpu as pltpu


def _round_up(x, m):
    return (x + m - 1) // m * m


def _down_kernel(s_ref, w1_ref, sc1_ref, bi1_ref, w2_ref, sc2_ref, bi2_ref,
                 out_ref, pad_ref, *, Hp, Wp, Cin, Cout, cdtype):
    # s_ref: (4, Hp+1, Wp+1, Cin) space-to-depth of the (-inf)-padded input:
    #        s[2*p + q, a, b, c] == x_pad[2a + p, 2b + q, c]
    Cmax = pad_ref.shape[-1]

    # --- MaxPool2d(kernel_size=3, stride=2, padding=1) ----------------------
    # pooled[i, j, c] = max_{dy,dx in 0..2} x_pad[2i + dy, 2j + dx, c]
    # Slice the Ref directly (static slices are free; no whole-block load).
    offs = ((0, 0), (0, 1), (1, 0))  # dy (or dx) -> (block offset, parity)
    pooled = None
    for ao, p in offs:
        for bo, q in offs:
            t = s_ref[2 * p + q, pl.ds(ao, Hp), pl.ds(bo, Wp), :]
            pooled = t if pooled is None else jnp.maximum(pooled, t)

    # --- zero only the 1-pixel border of the shared pad scratch -------------
    # (interior is fully overwritten below; done every step so it is correct
    #  even when the batch axis is split across TensorCores)
    pad_ref[pl.ds(0, 1), :, :] = jnp.zeros((1, Wp + 2, Cmax), cdtype)
    pad_ref[pl.ds(Hp + 1, 1), :, :] = jnp.zeros((1, Wp + 2, Cmax), cdtype)
    pad_ref[pl.ds(1, Hp), pl.ds(0, 1), :] = jnp.zeros((Hp, 1, Cmax), cdtype)
    pad_ref[pl.ds(1, Hp), pl.ds(Wp + 1, 1), :] = jnp.zeros((Hp, 1, Cmax), cdtype)

    # --- conv3x3 (pad=1, no bias) + folded BatchNorm (eval) + ReLU ----------
    # Fused im2col: one MXU dot with K = 9*cin instead of nine K=cin dots.
    def conv_bn_relu(w_ref, sc_ref, bi_ref, cin):
        wins = [pad_ref[pl.ds(dy, Hp), pl.ds(dx, Wp), pl.ds(0, cin)]
                for dy in range(3) for dx in range(3)]
        lhs = jnp.concatenate(wins, axis=-1).reshape(Hp * Wp, 9 * cin)
        acc = jnp.dot(lhs, w_ref[...], preferred_element_type=jnp.float32)
        y = acc * sc_ref[...] + bi_ref[...]   # folded BatchNorm (eval), f32
        return jnp.maximum(y, 0.0)            # ReLU

    # conv1: input = pooled (Cin channels of the shared pad scratch)
    pad_ref[pl.ds(1, Hp), pl.ds(1, Wp), pl.ds(0, Cin)] = pooled.astype(cdtype)
    h = conv_bn_relu(w1_ref, sc1_ref, bi1_ref, Cin)            # (Hp*Wp, Cout) f32

    # conv2: input = conv1 output (Cout channels of the same scratch)
    pad_ref[pl.ds(1, Hp), pl.ds(1, Wp), pl.ds(0, Cout)] = (
        h.reshape(Hp, Wp, Cout).astype(cdtype))
    y = conv_bn_relu(w2_ref, sc2_ref, bi2_ref, Cout)           # (Hp*Wp, Cout_p) f32

    out_ref[...] = y.astype(out_ref.dtype)                     # lane-dense store


def down_forward(x_nchw, params, *, compute_dtype=jnp.bfloat16):
    """Pallas implementation of down.forward. x_nchw: (N, Cin, H, W) float32."""
    w1, sc1, bi1, w2, sc2, bi2 = params
    N, Cin, H, W = x_nchw.shape
    assert H % 2 == 0 and W % 2 == 0, "even spatial dims assumed"
    Hp, Wp = H // 2, W // 2
    Cout = w1.shape[0]
    Cout_p = _round_up(Cout, 128)          # lane-dense output (unmasked stores)
    Cmax = max(Cin, Cout)

    # NCHW -> NHWC (+ cast), -inf border, space-to-depth for the stride-2 pool.
    # XLA fuses pad/reshape/transpose into the (mandatory) NCHW->NHWC layout
    # pass, so this is a single rewrite of the input in HBM.
    x = jnp.transpose(x_nchw, (0, 2, 3, 1)).astype(compute_dtype)
    neg_inf = jnp.asarray(-jnp.inf, compute_dtype)
    xp = jnp.pad(x, ((0, 0), (1, 1), (1, 1), (0, 0)), constant_values=neg_inf)
    s = xp.reshape(N, Hp + 1, 2, Wp + 1, 2, Cin)
    s = jnp.transpose(s, (0, 2, 4, 1, 3, 5))        # (N, p, q, a, b, c)
    s = s.reshape(N, 4, Hp + 1, Wp + 1, Cin)

    # Conv weights: PyTorch OIHW -> im2col matrices (9*C_in, C_out), tap-major.
    w1k = jnp.transpose(w1, (2, 3, 1, 0)).reshape(9 * Cin, Cout)
    w1k = w1k.astype(compute_dtype)
    w2k = jnp.transpose(w2, (2, 3, 1, 0)).reshape(9 * Cout, Cout)
    w2k = jnp.pad(w2k, ((0, 0), (0, Cout_p - Cout))).astype(compute_dtype)
    sc1r = sc1.reshape(1, Cout).astype(jnp.float32)
    bi1r = bi1.reshape(1, Cout).astype(jnp.float32)
    sc2r = jnp.pad(sc2.reshape(1, Cout).astype(jnp.float32),
                   ((0, 0), (0, Cout_p - Cout)))
    bi2r = jnp.pad(bi2.reshape(1, Cout).astype(jnp.float32),
                   ((0, 0), (0, Cout_p - Cout)))

    # Size the scoped VMEM limit from the actual (double-buffered) footprint.
    isz = jnp.dtype(compute_dtype).itemsize
    est = (2 * 4 * (Hp + 1) * (Wp + 1) * Cin * isz            # s block  (x2 bufs)
           + 2 * (9 * Cin * Cout + 9 * Cout * Cout_p) * isz   # weights  (x2 bufs)
           + 2 * Hp * Wp * Cout_p * 4                         # out block(x2 bufs)
           + (Hp + 2) * (Wp + 2) * Cmax * isz                 # pad scratch
           + 4 * Hp * Wp * 9 * Cmax * isz)                    # im2col temporaries
    vmem_limit = int(min(max(4 * est, 32 * 2**20), 64 * 2**20))

    kernel = functools.partial(_down_kernel, Hp=Hp, Wp=Wp, Cin=Cin, Cout=Cout,
                               cdtype=compute_dtype)

    out = pl.pallas_call(
        kernel,
        out_shape=jax.ShapeDtypeStruct((N, Hp * Wp, Cout_p), jnp.float32),
        grid_spec=pltpu.PrefetchScalarGridSpec(
            num_scalar_prefetch=0,
            grid=(N,),
            in_specs=[
                pl.BlockSpec((None, 4, Hp + 1, Wp + 1, Cin),
                             lambda b: (b, 0, 0, 0, 0)),
                pl.BlockSpec((9 * Cin, Cout), lambda b: (0, 0)),
                pl.BlockSpec((1, Cout), lambda b: (0, 0)),
                pl.BlockSpec((1, Cout), lambda b: (0, 0)),
                pl.BlockSpec((9 * Cout, Cout_p), lambda b: (0, 0)),
                pl.BlockSpec((1, Cout_p), lambda b: (0, 0)),
                pl.BlockSpec((1, Cout_p), lambda b: (0, 0)),
            ],
            out_specs=pl.BlockSpec((None, Hp * Wp, Cout_p),
                                   lambda b: (b, 0, 0)),
            scratch_shapes=[
                pltpu.VMEM((Hp + 2, Wp + 2, Cmax), compute_dtype),
            ],
        ),
        compiler_params=pltpu.CompilerParams(
            dimension_semantics=("parallel",),
            vmem_limit_bytes=vmem_limit),
    )(s, w1k, sc1r, bi1r, w2k, sc2r, bi2r)

    out = out[:, :, :Cout].reshape(N, Hp, Wp, Cout)   # drop channel padding
    return jnp.transpose(out, (0, 3, 1, 2))           # back to NCHW


def down_reference(x, params):
    """Pure-JAX (XLA) reference mirroring the PyTorch forward (eval-mode BN)."""
    w1, sc1, bi1, w2, sc2, bi2 = params
    y = lax.reduce_window(x, -jnp.inf, lax.max, (1, 1, 3, 3), (1, 1, 2, 2),
                          padding=((0, 0), (0, 0), (1, 1), (1, 1)))

    def cbr(y, w, sc, bi):
        y = lax.conv_general_dilated(y, w, (1, 1), ((1, 1), (1, 1)),
                                     dimension_numbers=("NCHW", "OIHW", "NCHW"))
        y = y * sc[None, :, None, None] + bi[None, :, None, None]
        return jnp.maximum(y, 0.0)

    y = cbr(y, w1, sc1, bi1)
    y = cbr(y, w2, sc2, bi2)
    return y


if __name__ == "__main__":
    N, Cin, Cout, H, W = 2, 8, 16, 16, 16

    key = jax.random.PRNGKey(0)
    ks = jax.random.split(key, 11)
    x = jax.random.normal(ks[0], (N, Cin, H, W), jnp.float32)

    # Deterministic synthetic parameters (shapes per nn.Conv2d / nn.BatchNorm2d).
    w1 = jax.random.normal(ks[1], (Cout, Cin, 3, 3), jnp.float32) * 0.2
    g1 = jax.random.uniform(ks[2], (Cout,), jnp.float32, 0.5, 1.5)
    b1 = jax.random.normal(ks[3], (Cout,), jnp.float32) * 0.1
    rm1 = jax.random.normal(ks[4], (Cout,), jnp.float32) * 0.1
    rv1 = jax.random.uniform(ks[5], (Cout,), jnp.float32, 0.5, 1.5)
    w2 = jax.random.normal(ks[6], (Cout, Cout, 3, 3), jnp.float32) * 0.2
    g2 = jax.random.uniform(ks[7], (Cout,), jnp.float32, 0.5, 1.5)
    b2 = jax.random.normal(ks[8], (Cout,), jnp.float32) * 0.1
    rm2 = jax.random.normal(ks[9], (Cout,), jnp.float32) * 0.1
    rv2 = jax.random.uniform(ks[10], (Cout,), jnp.float32, 0.5, 1.5)

    eps = 1e-5  # PyTorch BatchNorm2d default
    sc1 = g1 / jnp.sqrt(rv1 + eps)
    bi1 = b1 - rm1 * sc1
    sc2 = g2 / jnp.sqrt(rv2 + eps)
    bi2 = b2 - rm2 * sc2
    params = (w1, sc1, bi1, w2, sc2, bi2)

    down_jit = jax.jit(down_forward, static_argnames=("compute_dtype",))
    ref = down_reference(x, params)

    # f32 MXU path: tight numerical check against the XLA reference.
    out_f32 = jax.block_until_ready(down_jit(x, params, compute_dtype=jnp.float32))
    assert out_f32.shape == ref.shape == (N, Cout, H // 2, W // 2)
    if not bool(jnp.allclose(out_f32, ref, rtol=1e-3, atol=1e-3)):
        raise AssertionError("Pallas kernel (f32) output mismatch vs JAX reference")

    # bf16 MXU path (default, v6e/v7x-oriented): looser check (operand rounding).
    out_bf16 = jax.block_until_ready(down_jit(x, params, compute_dtype=jnp.bfloat16))
    assert out_bf16.shape == ref.shape
    if not bool(jnp.allclose(out_bf16, ref, rtol=1e-1, atol=1e-1)):
        raise AssertionError("Pallas kernel (bf16) output mismatch vs JAX reference")

    print("KERNEL_OK")
</pallas_src>

<mosaic_0001>
module attributes {stable_mosaic.version = 11 : i64} {
  func.func @_down_kernel(%arg0: i32, %arg1: memref<1x4x9x9x8xf32, #tpu.memory_space<vmem>>, %arg2: memref<72x16xf32, #tpu.memory_space<vmem>>, %arg3: memref<1x16xf32, #tpu.memory_space<vmem>>, %arg4: memref<1x16xf32, #tpu.memory_space<vmem>>, %arg5: memref<144x128xf32, #tpu.memory_space<vmem>>, %arg6: memref<1x128xf32, #tpu.memory_space<vmem>>, %arg7: memref<1x128xf32, #tpu.memory_space<vmem>>, %arg8: memref<1x64x128xf32, #tpu.memory_space<vmem>>, %arg9: memref<10x10x16xf32, #tpu.memory_space<vmem>>) attributes {dimension_semantics = [#tpu.dimension_semantics<parallel>], iteration_bounds = array<i64: 2>, scalar_prefetch = 0 : i64, scratch_operands = 1 : i64, tpu.core_type = #tpu.core_type<tc>, window_params = [{transform_indices = @transform_0, window_bounds = array<i64: 1, 4, 9, 9, 8>}, {pipeline_mode = #tpu.pipeline_mode<synchronous>, transform_indices = @transform_1, window_bounds = array<i64: 72, 16>}, {pipeline_mode = #tpu.pipeline_mode<synchronous>, transform_indices = @transform_2, window_bounds = array<i64: 1, 16>}, {pipeline_mode = #tpu.pipeline_mode<synchronous>, transform_indices = @transform_3, window_bounds = array<i64: 1, 16>}, {pipeline_mode = #tpu.pipeline_mode<synchronous>, transform_indices = @transform_4, window_bounds = array<i64: 144, 128>}, {pipeline_mode = #tpu.pipeline_mode<synchronous>, transform_indices = @transform_5, window_bounds = array<i64: 1, 128>}, {pipeline_mode = #tpu.pipeline_mode<synchronous>, transform_indices = @transform_6, window_bounds = array<i64: 1, 128>}, {transform_indices = @transform_7, window_bounds = array<i64: 1, 64, 128>}]} {
    %c0 = arith.constant 0 : index
    %c0_0 = arith.constant 0 : index
    %c0_1 = arith.constant 0 : index
    %c0_2 = arith.constant 0 : index
    %c0_3 = arith.constant 0 : index
    %0 = vector.load %arg1[%c0, %c0_0, %c0_1, %c0_2, %c0_3] : memref<1x4x9x9x8xf32, #tpu.memory_space<vmem>>, vector<1x1x8x8x8xf32>
    %1 = vector.shape_cast %0 : vector<1x1x8x8x8xf32> to vector<8x8x8xf32>
    %c0_4 = arith.constant 0 : index
    %c1 = arith.constant 1 : index
    %c0_5 = arith.constant 0 : index
    %c0_6 = arith.constant 0 : index
    %c0_7 = arith.constant 0 : index
    %2 = vector.load %arg1[%c0_4, %c1, %c0_5, %c0_6, %c0_7] : memref<1x4x9x9x8xf32, #tpu.memory_space<vmem>>, vector<1x1x8x8x8xf32>
    %3 = vector.shape_cast %2 : vector<1x1x8x8x8xf32> to vector<8x8x8xf32>
    %4 = arith.maximumf %1, %3 : vector<8x8x8xf32>
    %c0_8 = arith.constant 0 : index
    %c0_9 = arith.constant 0 : index
    %c0_10 = arith.constant 0 : index
    %c1_11 = arith.constant 1 : index
    %c0_12 = arith.constant 0 : index
    %5 = vector.load %arg1[%c0_8, %c0_9, %c0_10, %c1_11, %c0_12] : memref<1x4x9x9x8xf32, #tpu.memory_space<vmem>>, vector<1x1x8x8x8xf32>
    %6 = vector.shape_cast %5 : vector<1x1x8x8x8xf32> to vector<8x8x8xf32>
    %7 = arith.maximumf %4, %6 : vector<8x8x8xf32>
    %c0_13 = arith.constant 0 : index
    %c2 = arith.constant 2 : index
    %c0_14 = arith.constant 0 : index
    %c0_15 = arith.constant 0 : index
    %c0_16 = arith.constant 0 : index
    %8 = vector.load %arg1[%c0_13, %c2, %c0_14, %c0_15, %c0_16] : memref<1x4x9x9x8xf32, #tpu.memory_space<vmem>>, vector<1x1x8x8x8xf32>
    %9 = vector.shape_cast %8 : vector<1x1x8x8x8xf32> to vector<8x8x8xf32>
    %10 = arith.maximumf %7, %9 : vector<8x8x8xf32>
    %c0_17 = arith.constant 0 : index
    %c3 = arith.constant 3 : index
    %c0_18 = arith.constant 0 : index
    %c0_19 = arith.constant 0 : index
    %c0_20 = arith.constant 0 : index
    %11 = vector.load %arg1[%c0_17, %c3, %c0_18, %c0_19, %c0_20] : memref<1x4x9x9x8xf32, #tpu.memory_space<vmem>>, vector<1x1x8x8x8xf32>
    %12 = vector.shape_cast %11 : vector<1x1x8x8x8xf32> to vector<8x8x8xf32>
    %13 = arith.maximumf %10, %12 : vector<8x8x8xf32>
    %c0_21 = arith.constant 0 : index
    %c2_22 = arith.constant 2 : index
    %c0_23 = arith.constant 0 : index
    %c1_24 = arith.constant 1 : index
    %c0_25 = arith.constant 0 : index
    %14 = vector.load %arg1[%c0_21, %c2_22, %c0_23, %c1_24, %c0_25] : memref<1x4x9x9x8xf32, #tpu.memory_space<vmem>>, vector<1x1x8x8x8xf32>
    %15 = vector.shape_cast %14 : vector<1x1x8x8x8xf32> to vector<8x8x8xf32>
    %16 = arith.maximumf %13, %15 : vector<8x8x8xf32>
    %c0_26 = arith.constant 0 : index
    %c0_27 = arith.constant 0 : index
    %c1_28 = arith.constant 1 : index
    %c0_29 = arith.constant 0 : index
    %c0_30 = arith.constant 0 : index
    %17 = vector.load %arg1[%c0_26, %c0_27, %c1_28, %c0_29, %c0_30] : memref<1x4x9x9x8xf32, #tpu.memory_space<vmem>>, vector<1x1x8x8x8xf32>
    %18 = vector.shape_cast %17 : vector<1x1x8x8x8xf32> to vector<8x8x8xf32>
    %19 = arith.maximumf %16, %18 : vector<8x8x8xf32>
    %c0_31 = arith.constant 0 : index
    %c1_32 = arith.constant 1 : index
    %c1_33 = arith.constant 1 : index
    %c0_34 = arith.constant 0 : index
    %c0_35 = arith.constant 0 : index
    %20 = vector.load %arg1[%c0_31, %c1_32, %c1_33, %c0_34, %c0_35] : memref<1x4x9x9x8xf32, #tpu.memory_space<vmem>>, vector<1x1x8x8x8xf32>
    %21 = vector.shape_cast %20 : vector<1x1x8x8x8xf32> to vector<8x8x8xf32>
    %22 = arith.maximumf %19, %21 : vector<8x8x8xf32>
    %c0_36 = arith.constant 0 : index
    %c0_37 = arith.constant 0 : index
    %c1_38 = arith.constant 1 : index
    %c1_39 = arith.constant 1 : index
    %c0_40 = arith.constant 0 : index
    %23 = vector.load %arg1[%c0_36, %c0_37, %c1_38, %c1_39, %c0_40] : memref<1x4x9x9x8xf32, #tpu.memory_space<vmem>>, vector<1x1x8x8x8xf32>
    %24 = vector.shape_cast %23 : vector<1x1x8x8x8xf32> to vector<8x8x8xf32>
    %25 = arith.maximumf %22, %24 : vector<8x8x8xf32>
    %cst = arith.constant 0.000000e+00 : f32
    %26 = vector.broadcast %cst : f32 to vector<1x10x16xf32>
    %c0_41 = arith.constant 0 : index
    %c0_42 = arith.constant 0 : index
    %c0_43 = arith.constant 0 : index
    %27 = vector.load %arg9[%c0_41, %c0_42, %c0_43] : memref<10x10x16xf32, #tpu.memory_space<vmem>>, vector<1x10x16xf32>
    tpu.vector_store %arg9[%c0_41, %c0_42, %c0_43], %26 {strides = array<i32>} : memref<10x10x16xf32, #tpu.memory_space<vmem>>, vector<1x10x16xf32>,
    %cst_44 = arith.constant 0.000000e+00 : f32
    %28 = vector.broadcast %cst_44 : f32 to vector<1x10x16xf32>
    %c9 = arith.constant 9 : index
    %c0_45 = arith.constant 0 : index
    %c0_46 = arith.constant 0 : index
    %29 = vector.load %arg9[%c9, %c0_45, %c0_46] : memref<10x10x16xf32, #tpu.memory_space<vmem>>, vector<1x10x16xf32>
    tpu.vector_store %arg9[%c9, %c0_45, %c0_46], %28 {strides = array<i32>} : memref<10x10x16xf32, #tpu.memory_space<vmem>>, vector<1x10x16xf32>,
    %cst_47 = arith.constant 0.000000e+00 : f32
    %30 = vector.broadcast %cst_47 : f32 to vector<8x1x16xf32>
    %c1_48 = arith.constant 1 : index
    %c0_49 = arith.constant 0 : index
    %c0_50 = arith.constant 0 : index
    %31 = vector.load %arg9[%c1_48, %c0_49, %c0_50] : memref<10x10x16xf32, #tpu.memory_space<vmem>>, vector<8x1x16xf32>
    tpu.vector_store %arg9[%c1_48, %c0_49, %c0_50], %30 {strides = array<i32>} : memref<10x10x16xf32, #tpu.memory_space<vmem>>, vector<8x1x16xf32>,
    %cst_51 = arith.constant 0.000000e+00 : f32
    %32 = vector.broadcast %cst_51 : f32 to vector<8x1x16xf32>
    %c1_52 = arith.constant 1 : index
    %c9_53 = arith.constant 9 : index
    %c0_54 = arith.constant 0 : index
    %33 = vector.load %arg9[%c1_52, %c9_53, %c0_54] : memref<10x10x16xf32, #tpu.memory_space<vmem>>, vector<8x1x16xf32>
    tpu.vector_store %arg9[%c1_52, %c9_53, %c0_54], %32 {strides = array<i32>} : memref<10x10x16xf32, #tpu.memory_space<vmem>>, vector<8x1x16xf32>,
    %c1_55 = arith.constant 1 : index
    %c1_56 = arith.constant 1 : index
    %c0_57 = arith.constant 0 : index
    %34 = vector.load %arg9[%c1_55, %c1_56, %c0_57] : memref<10x10x16xf32, #tpu.memory_space<vmem>>, vector<8x8x8xf32>
    tpu.vector_store %arg9[%c1_55, %c1_56, %c0_57], %25 {strides = array<i32>} : memref<10x10x16xf32, #tpu.memory_space<vmem>>, vector<8x8x8xf32>,
    %c0_58 = arith.constant 0 : index
    %c0_59 = arith.constant 0 : index
    %c0_60 = arith.constant 0 : index
    %35 = vector.load %arg9[%c0_58, %c0_59, %c0_60] : memref<10x10x16xf32, #tpu.memory_space<vmem>>, vector<8x8x8xf32>
    %c0_61 = arith.constant 0 : index
    %c1_62 = arith.constant 1 : index
    %c0_63 = arith.constant 0 : index
    %36 = vector.load %arg9[%c0_61, %c1_62, %c0_63] : memref<10x10x16xf32, #tpu.memory_space<vmem>>, vector<8x8x8xf32>
    %c0_64 = arith.constant 0 : index
    %c2_65 = arith.constant 2 : index
    %c0_66 = arith.constant 0 : index
    %37 = vector.load %arg9[%c0_64, %c2_65, %c0_66] : memref<10x10x16xf32, #tpu.memory_space<vmem>>, vector<8x8x8xf32>
    %c1_67 = arith.constant 1 : index
    %c0_68 = arith.constant 0 : index
    %c0_69 = arith.constant 0 : index
    %38 = vector.load %arg9[%c1_67, %c0_68, %c0_69] : memref<10x10x16xf32, #tpu.memory_space<vmem>>, vector<8x8x8xf32>
    %c1_70 = arith.constant 1 : index
    %c1_71 = arith.constant 1 : index
    %c0_72 = arith.constant 0 : index
    %39 = vector.load %arg9[%c1_70, %c1_71, %c0_72] : memref<10x10x16xf32, #tpu.memory_space<vmem>>, vector<8x8x8xf32>
    %c1_73 = arith.constant 1 : index
    %c2_74 = arith.constant 2 : index
    %c0_75 = arith.constant 0 : index
    %40 = vector.load %arg9[%c1_73, %c2_74, %c0_75] : memref<10x10x16xf32, #tpu.memory_space<vmem>>, vector<8x8x8xf32>
    %c2_76 = arith.constant 2 : index
    %c0_77 = arith.constant 0 : index
    %c0_78 = arith.constant 0 : index
    %41 = vector.load %arg9[%c2_76, %c0_77, %c0_78] : memref<10x10x16xf32, #tpu.memory_space<vmem>>, vector<8x8x8xf32>
    %c2_79 = arith.constant 2 : index
    %c1_80 = arith.constant 1 : index
    %c0_81 = arith.constant 0 : index
    %42 = vector.load %arg9[%c2_79, %c1_80, %c0_81] : memref<10x10x16xf32, #tpu.memory_space<vmem>>, vector<8x8x8xf32>
    %c2_82 = arith.constant 2 : index
    %c2_83 = arith.constant 2 : index
    %c0_84 = arith.constant 0 : index
    %43 = vector.load %arg9[%c2_82, %c2_83, %c0_84] : memref<10x10x16xf32, #tpu.memory_space<vmem>>, vector<8x8x8xf32>
    %44 = tpu.concatenate %35, %36, %37, %38, %39, %40, %41, %42, %43 in 2 : vector<8x8x8xf32>, vector<8x8x8xf32>, vector<8x8x8xf32>, vector<8x8x8xf32>, vector<8x8x8xf32>, vector<8x8x8xf32>, vector<8x8x8xf32>, vector<8x8x8xf32>, vector<8x8x8xf32> -> vector<8x8x72xf32>
    %45 = vector.shape_cast %44 : vector<8x8x72xf32> to vector<64x72xf32>
    %c0_85 = arith.constant 0 : index
    %c0_86 = arith.constant 0 : index
    %46 = vector.load %arg2[%c0_85, %c0_86] : memref<72x16xf32, #tpu.memory_space<vmem>>, vector<72x16xf32>
    %cst_87 = arith.constant dense<0.000000e+00> : vector<64x16xf32>
    %47 = tpu.matmul %45, %46, %cst_87 {dimension_numbers = #tpu.dot_dimension_numbers<[1], [0], [0], [1], [0, 0, 1, 1], [], []>} : vector<64x72xf32>, vector<72x16xf32>, vector<64x16xf32> -> vector<64x16xf32>
    %c0_88 = arith.constant 0 : index
    %c0_89 = arith.constant 0 : index
    %48 = vector.load %arg3[%c0_88, %c0_89] : memref<1x16xf32, #tpu.memory_space<vmem>>, vector<1x16xf32>
    %49 = vector.broadcast %48 : vector<1x16xf32> to vector<64x16xf32>
    %50 = arith.mulf %47, %49 : vector<64x16xf32>
    %c0_90 = arith.constant 0 : index
    %c0_91 = arith.constant 0 : index
    %51 = vector.load %arg4[%c0_90, %c0_91] : memref<1x16xf32, #tpu.memory_space<vmem>>, vector<1x16xf32>
    %52 = vector.broadcast %51 : vector<1x16xf32> to vector<64x16xf32>
    %53 = arith.addf %50, %52 : vector<64x16xf32>
    %cst_92 = arith.constant 0.000000e+00 : f32
    %54 = vector.broadcast %cst_92 : f32 to vector<64x16xf32>
    %55 = arith.maximumf %53, %54 : vector<64x16xf32>
    %56 = vector.shape_cast %55 : vector<64x16xf32> to vector<8x8x16xf32>
    %c1_93 = arith.constant 1 : index
    %c1_94 = arith.constant 1 : index
    %c0_95 = arith.constant 0 : index
    %57 = vector.load %arg9[%c1_93, %c1_94, %c0_95] : memref<10x10x16xf32, #tpu.memory_space<vmem>>, vector<8x8x16xf32>
    tpu.vector_store %arg9[%c1_93, %c1_94, %c0_95], %56 {strides = array<i32>} : memref<10x10x16xf32, #tpu.memory_space<vmem>>, vector<8x8x16xf32>,
    %c0_96 = arith.constant 0 : index
    %c0_97 = arith.constant 0 : index
    %c0_98 = arith.constant 0 : index
    %58 = vector.load %arg9[%c0_96, %c0_97, %c0_98] : memref<10x10x16xf32, #tpu.memory_space<vmem>>, vector<8x8x16xf32>
    %c0_99 = arith.constant 0 : index
    %c1_100 = arith.constant 1 : index
    %c0_101 = arith.constant 0 : index
    %59 = vector.load %arg9[%c0_99, %c1_100, %c0_101] : memref<10x10x16xf32, #tpu.memory_space<vmem>>, vector<8x8x16xf32>
    %c0_102 = arith.constant 0 : index
    %c2_103 = arith.constant 2 : index
    %c0_104 = arith.constant 0 : index
    %60 = vector.load %arg9[%c0_102, %c2_103, %c0_104] : memref<10x10x16xf32, #tpu.memory_space<vmem>>, vector<8x8x16xf32>
    %c1_105 = arith.constant 1 : index
    %c0_106 = arith.constant 0 : index
    %c0_107 = arith.constant 0 : index
    %61 = vector.load %arg9[%c1_105, %c0_106, %c0_107] : memref<10x10x16xf32, #tpu.memory_space<vmem>>, vector<8x8x16xf32>
    %c1_108 = arith.constant 1 : index
    %c1_109 = arith.constant 1 : index
    %c0_110 = arith.constant 0 : index
    %62 = vector.load %arg9[%c1_108, %c1_109, %c0_110] : memref<10x10x16xf32, #tpu.memory_space<vmem>>, vector<8x8x16xf32>
    %c1_111 = arith.constant 1 : index
    %c2_112 = arith.constant 2 : index
    %c0_113 = arith.constant 0 : index
    %63 = vector.load %arg9[%c1_111, %c2_112, %c0_113] : memref<10x10x16xf32, #tpu.memory_space<vmem>>, vector<8x8x16xf32>
    %c2_114 = arith.constant 2 : index
    %c0_115 = arith.constant 0 : index
    %c0_116 = arith.constant 0 : index
    %64 = vector.load %arg9[%c2_114, %c0_115, %c0_116] : memref<10x10x16xf32, #tpu.memory_space<vmem>>, vector<8x8x16xf32>
    %c2_117 = arith.constant 2 : index
    %c1_118 = arith.constant 1 : index
    %c0_119 = arith.constant 0 : index
    %65 = vector.load %arg9[%c2_117, %c1_118, %c0_119] : memref<10x10x16xf32, #tpu.memory_space<vmem>>, vector<8x8x16xf32>
    %c2_120 = arith.constant 2 : index
    %c2_121 = arith.constant 2 : index
    %c0_122 = arith.constant 0 : index
    %66 = vector.load %arg9[%c2_120, %c2_121, %c0_122] : memref<10x10x16xf32, #tpu.memory_space<vmem>>, vector<8x8x16xf32>
    %67 = tpu.concatenate %58, %59, %60, %61, %62, %63, %64, %65, %66 in 2 : vector<8x8x16xf32>, vector<8x8x16xf32>, vector<8x8x16xf32>, vector<8x8x16xf32>, vector<8x8x16xf32>, vector<8x8x16xf32>, vector<8x8x16xf32>, vector<8x8x16xf32>, vector<8x8x16xf32> -> vector<8x8x144xf32>
    %68 = vector.shape_cast %67 : vector<8x8x144xf32> to vector<64x144xf32>
    %c0_123 = arith.constant 0 : index
    %c0_124 = arith.constant 0 : index
    %69 = vector.load %arg5[%c0_123, %c0_124] : memref<144x128xf32, #tpu.memory_space<vmem>>, vector<144x128xf32>
    %cst_125 = arith.constant dense<0.000000e+00> : vector<64x128xf32>
    %70 = tpu.matmul %68, %69, %cst_125 {dimension_numbers = #tpu.dot_dimension_numbers<[1], [0], [0], [1], [0, 0, 1, 1], [], []>} : vector<64x144xf32>, vector<144x128xf32>, vector<64x128xf32> -> vector<64x128xf32>
    %c0_126 = arith.constant 0 : index
    %c0_127 = arith.constant 0 : index
    %71 = vector.load %arg6[%c0_126, %c0_127] : memref<1x128xf32, #tpu.memory_space<vmem>>, vector<1x128xf32>
    %72 = vector.broadcast %71 : vector<1x128xf32> to vector<64x128xf32>
    %73 = arith.mulf %70, %72 : vector<64x128xf32>
    %c0_128 = arith.constant 0 : index
    %c0_129 = arith.constant 0 : index
    %74 = vector.load %arg7[%c0_128, %c0_129] : memref<1x128xf32, #tpu.memory_space<vmem>>, vector<1x128xf32>
    %75 = vector.broadcast %74 : vector<1x128xf32> to vector<64x128xf32>
    %76 = arith.addf %73, %75 : vector<64x128xf32>
    %cst_130 = arith.constant 0.000000e+00 : f32
    %77 = vector.broadcast %cst_130 : f32 to vector<64x128xf32>
    %78 = arith.maximumf %76, %77 : vector<64x128xf32>
    %c0_131 = arith.constant 0 : index
    %c0_132 = arith.constant 0 : index
    %c0_133 = arith.constant 0 : index
    %79 = vector.load %arg8[%c0_131, %c0_132, %c0_133] : memref<1x64x128xf32, #tpu.memory_space<vmem>>, vector<1x64x128xf32>
    %80 = vector.shape_cast %79 : vector<1x64x128xf32> to vector<64x128xf32>
    %81 = vector.shape_cast %78 : vector<64x128xf32> to vector<1x64x128xf32>
    tpu.vector_store %arg8[%c0_131, %c0_132, %c0_133], %81 {strides = array<i32>} : memref<1x64x128xf32, #tpu.memory_space<vmem>>, vector<1x64x128xf32>,
    return
  }
  func.func @transform_0(%arg0: i32) -> (i32, i32, i32, i32, i32) {
    %c0_i32 = arith.constant 0 : i32
    %c0_i32_0 = arith.constant 0 : i32
    %c0_i32_1 = arith.constant 0 : i32
    %c0_i32_2 = arith.constant 0 : i32
    %c0_i32_3 = arith.constant 0 : i32
    return %arg0, %c0_i32, %c0_i32_0, %c0_i32_1, %c0_i32_2 : i32, i32, i32, i32, i32
  }
  func.func @transform_1(%arg0: i32) -> (i32, i32) {
    %c0_i32 = arith.constant 0 : i32
    %c0_i32_0 = arith.constant 0 : i32
    %c0_i32_1 = arith.constant 0 : i32
    return %c0_i32, %c0_i32_0 : i32, i32
  }
  func.func @transform_2(%arg0: i32) -> (i32, i32) {
    %c0_i32 = arith.constant 0 : i32
    %c0_i32_0 = arith.constant 0 : i32
    %c0_i32_1 = arith.constant 0 : i32
    return %c0_i32, %c0_i32_0 : i32, i32
  }
  func.func @transform_3(%arg0: i32) -> (i32, i32) {
    %c0_i32 = arith.constant 0 : i32
    %c0_i32_0 = arith.constant 0 : i32
    %c0_i32_1 = arith.constant 0 : i32
    return %c0_i32, %c0_i32_0 : i32, i32
  }
  func.func @transform_4(%arg0: i32) -> (i32, i32) {
    %c0_i32 = arith.constant 0 : i32
    %c0_i32_0 = arith.constant 0 : i32
    %c0_i32_1 = arith.constant 0 : i32
    return %c0_i32, %c0_i32_0 : i32, i32
  }
  func.func @transform_5(%arg0: i32) -> (i32, i32) {
    %c0_i32 = arith.constant 0 : i32
    %c0_i32_0 = arith.constant 0 : i32
    %c0_i32_1 = arith.constant 0 : i32
    return %c0_i32, %c0_i32_0 : i32, i32
  }
  func.func @transform_6(%arg0: i32) -> (i32, i32) {
    %c0_i32 = arith.constant 0 : i32
    %c0_i32_0 = arith.constant 0 : i32
    %c0_i32_1 = arith.constant 0 : i32
    return %c0_i32, %c0_i32_0 : i32, i32
  }
  func.func @transform_7(%arg0: i32) -> (i32, i32, i32) {
    %c0_i32 = arith.constant 0 : i32
    %c0_i32_0 = arith.constant 0 : i32
    %c0_i32_1 = arith.constant 0 : i32
    return %arg0, %c0_i32, %c0_i32_0 : i32, i32, i32
  }
}

</mosaic_0001>

<bundles_post_ra>
// kernel: down_forward.1
= control target key start
LH: loop header
LB: loop body
LE: loop exit
PB: predicated region body
PF: predicated region fallthrough
CT: control target
= control target key end

     0   :  { %s2032_s24 = smov 0   ;;  %s2699_s0 = inlined_call_operand.vmem [shape: f32[2,4,9,9,8], index: 0, kind: input, shape index: {}]   ;;  %s2700_s1 = inlined_call_operand.vmem [shape: f32[72,16], index: 1, kind: input, shape index: {}]   ;;  %s2701_s2 = inlined_call_operand.vmem [shape: f32[1,16], index: 2, kind: input, shape index: {}]   ;;  %s2702_s3 = inlined_call_operand.vmem [shape: f32[1,16], index: 3, kind: input, shape index: {}]   ;;  %s2703_s4 = inlined_call_operand.vmem [shape: f32[144,128], index: 4, kind: input, shape index: {}]   ;;  %s2704_s5 = inlined_call_operand.vmem [shape: f32[1,128], index: 5, kind: input, shape index: {}]   ;;  %s2705_s6 = inlined_call_operand.vmem [shape: f32[1,128], index: 6, kind: input, shape index: {}]   ;;  %s2706_s7 = inlined_call_operand.vmem [shape: f32[2,64,128], index: 7, kind: output, shape index: {}]  }
   0x1 LB: > { %s1641_s25 = sadd.s32 4294967295, %s1978_s24   ;;  %p1645_p0 = scmp.ge.s32.totalorder %s1978_s24, 1  ;;  %s1978_s24 = sphi %s2032_s24, %s17_s24  }
   0x2   : > { %p237_p1 = scmp.lt.s32.totalorder %s1978_s24, 3 }
   0x4   : > { %p238_p2 = pnand %p1645_p0, %p237_p1 }
   0x5   : > { %p2048_p3 = scmp.lt.s32.totalorder (!%p238_p2), %s1641_s25, 1  ;;  %s1981_s8 = smov (!%p238_p2), 16  }
   0x6   : > { %241 = sbr.rel (%p238_p2) target bundleno = 826 (0x33a), region = 48  ;;  %s1982_s9 = smov (!%p238_p2), 8  }
   0x7   : > { %s1983_s10 = smov (!%p238_p2), 24   ;;  %s1984_s13 = smov (!%p238_p2), 32  }
   0x8   : > { %s1985_s16 = smov (!%p238_p2), 40   ;;  %s1986_s21 = smov (!%p238_p2), 48  }
   0x9   : > { %s1988_s17 = smov (!%p238_p2), 64   ;;  %s1989_s22 = smov (!%p238_p2), 96  }
   0xa   : > { %s1990_s23 = smov (!%p238_p2), 80   ;;  %s1991_s26 = smov (!%p238_p2), 112  }
   0xb   : > { %vm420_vm0 = vcmask 130048   ;;  %vm422_vm1 = vcmask 123904   ;;  %vm428_vm2 = vcmask 122880   ;;  %v1980_v0 = vmov 0.0   ;;  %s2709_s25 = smov (!%p2048_p3, %s1641_s25), 1 }
   0xc   : > { %421 = vst.msk [vmem:[#allocation2] sm:$0xff] %vm420_vm0, %v1980_v0  ;;  %425 = vst.msk [vmem:[#allocation2 + $0x90] sm:$0xff] %vm420_vm0, %v1980_v0  ;;  %1775 = vmatprep.subr.mxu1 %v1980_v0  ;;  %s1811_s27 = smul.u32 576, %s2709_s25  ;;  %vm445_vm3 = vcmask 64512   ;;  %vm799_vm4 = vcmask 195584   ;;  %vm808_vm5 = vcmask 261120  }
   0xd   : > { %423 = vst.msk [vmem:[#allocation2 + $0x8] sm:$0x3] %vm422_vm1, %v1980_v0  ;;  %426 = vst.msk [vmem:[#allocation2 + $0x98] sm:$0x3] %vm422_vm1, %v1980_v0  ;;  %vm817_vm6 = vcmask 326656   ;;  %vm826_vm7 = vcmask 392192  }
   0xe   : > { %437 = vst.msk [vmem:[#allocation2 + $0x19] sm:$0x1] %vm428_vm2, %v1980_v0  ;;  %429 = vst.msk [vmem:[#allocation2 + $0x10] sm:$0x1] %vm428_vm2, %v1980_v0  ;;  %s2095_s30 = scalar_lea.vmem %s2699_s0, %s1811_s27  ;;  %vm835_vm8 = vcmask 457728   ;;  %vm844_vm9 = vcmask 523264  }
   0xf   : > { %430 = vst.msk [vmem:[#allocation2 + $0x20] sm:$0x1] %vm428_vm2, %v1980_v0  ;;  %431 = vst.msk [vmem:[#allocation2 + $0x30] sm:$0x1] %vm428_vm2, %v1980_v0  ;;  %v279_v3 = vld [vmem:[%s2095_s30] sm:$0xff]  ;;  %v1649_v4 = vld [vmem:[%s2095_s30 + $0x90] sm:$0xff] }
  0x10   : > { %432 = vst.msk [vmem:[#allocation2 + $0x40] sm:$0x1] %vm428_vm2, %v1980_v0  ;;  %433 = vst.msk [vmem:[#allocation2 + $0x50] sm:$0x1] %vm428_vm2, %v1980_v0  ;;  %v304_v5 = vld [vmem:[%s2095_s30 + $0x1] sm:$0xff]  ;;  %v296_v6 = vmax.f32 %v279_v3, %v1649_v4  ;;  %v1681_v8 = vld [vmem:[%s2095_s30 + $0x10] sm:$0xff] }
  0x11   : > { %434 = vst.msk [vmem:[#allocation2 + $0x60] sm:$0x1] %vm428_vm2, %v1980_v0  ;;  %435 = vst.msk [vmem:[#allocation2 + $0x70] sm:$0x1] %vm428_vm2, %v1980_v0  ;;  %v1657_v7 = vld [vmem:[%s2095_s30 + $0x120] sm:$0xff]  ;;  %v1697_v10 = vld [vmem:[%s2095_s30 + $0x11] sm:$0xff] }
  0x12   : > { %436 = vst.msk [vmem:[#allocation2 + $0x80] sm:$0x1] %vm428_vm2, %v1980_v0  ;;  %438 = vst.msk [vmem:[#allocation2 + $0x29] sm:$0x1] %vm428_vm2, %v1980_v0  ;;  %v1689_v9 = vld [vmem:[%s2095_s30 + $0xa0] sm:$0xff]  ;;  %v312_v11 = vmax.f32 %v296_v6, %v304_v5  ;;  %v1665_v12 = vld [vmem:[%s2095_s30 + $0x1b0] sm:$0xff] }
  0x13   : > { %439 = vst.msk [vmem:[#allocation2 + $0x39] sm:$0x1] %vm428_vm2, %v1980_v0  ;;  %440 = vst.msk [vmem:[#allocation2 + $0x49] sm:$0x1] %vm428_vm2, %v1980_v0  ;;  %v297_v13 = vmax.f32 %v1681_v8, %v1689_v9  ;;  %v1658_v14 = vld [vmem:[%s2095_s30 + $0x130] sm:$0xff]  ;;  %v1682_v15 = vld [vmem:[%s2095_s30 + $0x20] sm:$0xff] }
  0x14   : > { %441 = vst.msk [vmem:[#allocation2 + $0x59] sm:$0x1] %vm428_vm2, %v1980_v0  ;;  %442 = vst.msk [vmem:[#allocation2 + $0x69] sm:$0x1] %vm428_vm2, %v1980_v0  ;;  %v470_v1 = vld [vmem:[#allocation2 + $0x2] sm:$0xff]  ;;  %v2110_v16 = vld [vmem:[%s2095_s30 + $0xb0] sm:$0xff]  ;;  %v329_v17 = vmax.f32 %v312_v11, %v1657_v7 }
  0x15   : > { %443 = vst.msk [vmem:[#allocation2 + $0x79] sm:$0x1] %vm428_vm2, %v1980_v0  ;;  %444 = vst.msk [vmem:[#allocation2 + $0x89] sm:$0x1] %vm428_vm2, %v1980_v0  ;;  %v462_v2 = vld [vmem:[#allocation2 + $0x1] sm:$0xff]  ;;  %567 = vrot.lane.b32.xlu1 %v470_v1, %s1981_s8  ;;  %v313_v19 = vmax.f32 %v297_v13, %v1697_v10  ;;  %v298_v22 = vmax.f32 %v1682_v15, %v2110_v16  ;;  %v1683_v24 = vld [vmem:[%s2095_s30 + $0x30] sm:$0xff] }
  0x16   : > { %535 = vrot.lane.b32.xlu0 %v462_v2, %s1982_s9  ;;  %v1673_v18 = vld [vmem:[%s2095_s30 + $0x121] sm:$0xff]  ;;  %v346_v26 = vmax.f32 %v329_v17, %v1665_v12  ;;  %v1674_v28 = vld [vmem:[%s2095_s30 + $0x131] sm:$0xff]  ;;  %vm862_vm10 = vcmask 588800   ;;  %vm1366_vm11 = vcmask 654336   ;;  %vm1375_vm12 = vcmask 785408   ;;  %s1727_s27 = sshll.u32 %s2709_s25, 6 }
  0x17   : > { %v1666_v20 = vld [vmem:[%s2095_s30 + $0x1c0] sm:$0xff]  ;;  %v330_v27 = vmax.f32 %v313_v19, %v1658_v14  ;;  %v1667_v30 = vld [vmem:[%s2095_s30 + $0x1d0] sm:$0xff]  ;;  %vm1384_vm13 = vcmask 916480  }
  0x18   : > { %v1698_v21 = vld [vmem:[%s2095_s30 + $0x21] sm:$0xff]  ;;  %v1699_v32 = vld [vmem:[%s2095_s30 + $0x31] sm:$0xff]  ;;  %v362_v35 = vmax.f32 %v346_v26, %v1673_v18 }
  0x19   : > { %v1659_v23 = vld [vmem:[%s2095_s30 + $0x140] sm:$0xff]  ;;  %v314_v29 = vmax.f32 %v298_v22, %v1698_v21  ;;  %v1660_v33 = vld [vmem:[%s2095_s30 + $0x150] sm:$0xff]  ;;  %v347_v36 = vmax.f32 %v330_v27, %v1666_v20 }
  0x1a   : > { %v2119_v25 = vld [vmem:[%s2095_s30 + $0xc0] sm:$0xff]  ;;  %v2127_v34 = vld [vmem:[%s2095_s30 + $0xd0] sm:$0xff]  ;;  %v379_v45 = vmax.f32 %v362_v35, %v1681_v8 }
  0x1b   : > { %v299_v31 = vmax.f32 %v1683_v24, %v2119_v25  ;;  %v331_v37 = vmax.f32 %v314_v29, %v1659_v23  ;;  %v1684_v39 = vld [vmem:[%s2095_s30 + $0x40] sm:$0xff]  ;;  %v1676_v43 = vld [vmem:[%s2095_s30 + $0x151] sm:$0xff]  ;;  %v363_v46 = vmax.f32 %v347_v36, %v1674_v28 }
  0x1c   : > { %v2131_v40 = vld [vmem:[%s2095_s30 + $0x41] sm:$0xff]  ;;  %v300_v44 = vmax.f32 %v1684_v39, %v2127_v34  ;;  %v1685_v50 = vld [vmem:[%s2095_s30 + $0x50] sm:$0xff]  ;;  %v396_v57 = vmax.f32 %v379_v45, %v1689_v9 }
  0x1d   : > { %v315_v38 = vmax.f32 %v299_v31, %v1699_v32  ;;  %v1675_v41 = vld [vmem:[%s2095_s30 + $0x141] sm:$0xff]  ;;  %v348_v47 = vmax.f32 %v331_v37, %v1667_v30  ;;  %v1669_v53 = vld [vmem:[%s2095_s30 + $0x1f0] sm:$0xff]  ;;  %v380_v58 = vmax.f32 %v363_v46, %v1682_v15 }
  0x1e   : > { %v1668_v42 = vld [vmem:[%s2095_s30 + $0x1e0] sm:$0xff]  ;;  %v316_v52 = vmax.f32 %v300_v44, %v2131_v40  ;;  %v1701_v54 = vld [vmem:[%s2095_s30 + $0x51] sm:$0xff]  ;;  %v412_v6 = vmax.f32 %v396_v57, %v1697_v10 }
  0x1f   : > { %v332_v48 = vmax.f32 %v315_v38, %v1660_v33  ;;  %v1661_v49 = vld [vmem:[%s2095_s30 + $0x160] sm:$0xff]  ;;  %v2147_v56 = vld [vmem:[%s2095_s30 + $0xf0] sm:$0xff]  ;;  %v364_v59 = vmax.f32 %v348_v47, %v1675_v41  ;;  %v397_v7 = vmax.f32 %v380_v58, %v2110_v16 }
  0x20   : > { %v2140_v51 = vld [vmem:[%s2095_s30 + $0xe0] sm:$0xff]  ;;  %v1662_v61 = vld [vmem:[%s2095_s30 + $0x170] sm:$0xff]  ;;  %v333_v1 = vmax.f32 %v316_v52, %v1661_v49  ;;  %446 = vst.msk [vmem:[#allocation2 + $0x11] sm:$0xff] %vm445_vm3, %v412_v6 }
  0x21   : > { %v301_v55 = vmax.f32 %v1685_v50, %v2140_v51  ;;  %v349_v60 = vmax.f32 %v332_v48, %v1668_v42  ;;  %v1686_v62 = vld [vmem:[%s2095_s30 + $0x60] sm:$0xff]  ;;  %v381_v8 = vmax.f32 %v364_v59, %v1683_v24  ;;  %v1687_v12 = vld [vmem:[%s2095_s30 + $0x70] sm:$0xff]  ;;  %v413_v10 = vmax.f32 %v397_v7, %v1698_v21 }
  0x22   : > { %v1702_v63 = vld [vmem:[%s2095_s30 + $0x61] sm:$0xff]  ;;  %v302_v5 = vmax.f32 %v1686_v62, %v2147_v56  ;;  %v350_v14 = vmax.f32 %v333_v1, %v1669_v53  ;;  %v1678_v17 = vld [vmem:[%s2095_s30 + $0x171] sm:$0xff] }
  0x23   : > { %v1677_v2 = vld [vmem:[%s2095_s30 + $0x161] sm:$0xff]  ;;  %v317_v3 = vmax.f32 %v301_v55, %v1701_v54  ;;  %v365_v9 = vmax.f32 %v349_v60, %v1676_v43  ;;  %v398_v20 = vmax.f32 %v381_v8, %v2119_v25  ;;  %v1671_v22 = vld [vmem:[%s2095_s30 + $0x210] sm:$0xff]  ;;  %447 = vst.msk [vmem:[#allocation2 + $0x21] sm:$0xff] %vm445_vm3, %v413_v10 }
  0x24   : > { %v1670_v4 = vld [vmem:[%s2095_s30 + $0x200] sm:$0xff]  ;;  %v318_v18 = vmax.f32 %v302_v5, %v1702_v63  ;;  %v1703_v23 = vld [vmem:[%s2095_s30 + $0x71] sm:$0xff]  ;;  %v366_v26 = vmax.f32 %v350_v14, %v1677_v2  ;;  %v858_v1 = vld [vmem:[%s2700_s1 + $0x28] sm:$0xff] }
  0x25   : > { %v1663_v11 = vld [vmem:[%s2095_s30 + $0x180] sm:$0xff]  ;;  %v334_v15 = vmax.f32 %v317_v3, %v1662_v61  ;;  %v382_v16 = vmax.f32 %v365_v9, %v1684_v39  ;;  %v1664_v24 = vld [vmem:[%s2095_s30 + $0x190] sm:$0xff]  ;;  %v414_v30 = vmax.f32 %v398_v20, %v1699_v32  ;;  %v860_v61 = vld [vmem:[%s2700_s1 + $0x38] sm:$0xff] }
  0x26   : > { %v1695_v13 = vld [vmem:[%s2095_s30 + $0x100] sm:$0xff]  ;;  %v335_v28 = vmax.f32 %v318_v18, %v1663_v11  ;;  %v383_v21 = vmax.f32 %v366_v26, %v1685_v50  ;;  %v1680_v39 = vld [vmem:[%s2095_s30 + $0x191] sm:$0xff]  ;;  %v854_v8 = vld [vmem:[%s2700_s1 + $0x8] sm:$0xff] }
  0x27   : > { %v303_v19 = vmax.f32 %v1687_v12, %v1695_v13  ;;  %v351_v27 = vmax.f32 %v334_v15, %v1670_v4  ;;  %v399_v31 = vmax.f32 %v382_v16, %v2127_v34  ;;  %v1679_v33 = vld [vmem:[%s2095_s30 + $0x181] sm:$0xff]  ;;  %448 = vst.msk [vmem:[#allocation2 + $0x31] sm:$0xff] %vm445_vm3, %v414_v30  ;;  %v471_v44 = vld [vmem:[#allocation2 + $0x12] sm:$0xff] }
  0x28   : > { %v1672_v35 = vld [vmem:[%s2095_s30 + $0x220] sm:$0xff]  ;;  %v352_v25 = vmax.f32 %v335_v28, %v1671_v22  ;;  %v400_v41 = vmax.f32 %v383_v21, %v2140_v51  ;;  %v463_v45 = vld [vmem:[#allocation2 + $0x11] sm:$0xff]  ;;  %569 = vrot.lane.b32.xlu1 %v471_v44, %s1981_s8 }
  0x29   : > { %v319_v29 = vmax.f32 %v303_v19, %v1703_v23  ;;  %v367_v36 = vmax.f32 %v351_v27, %v1678_v17  ;;  %v415_v38 = vmax.f32 %v399_v31, %v2131_v40  ;;  %v1688_v34 = vld [vmem:[%s2095_s30 + $0x80] sm:$0xff]  ;;  %537 = vrot.lane.b32.xlu0 %v463_v45, %s1982_s9  ;;  %v1696_v40 = vld [vmem:[%s2095_s30 + $0x110] sm:$0xff]  ;;  %v856_v4 = vld [vmem:[%s2700_s1 + $0x18] sm:$0xff] }
  0x2a   : > { %v368_v43 = vmax.f32 %v352_v25, %v1679_v33  ;;  %v416_v46 = vmax.f32 %v400_v41, %v1701_v54  ;;  %v2179_v50 = vld [vmem:[#allocation2 + $0x20] sm:$0xff]  ;;  %v2181_v51 = vld [vmem:[#allocation2 + $0x10] sm:$0xff] }
  0x2b   : > { %v336_v37 = vmax.f32 %v319_v29, %v1664_v24  ;;  %v384_v42 = vmax.f32 %v367_v36, %v1686_v62  ;;  %449 = vst.msk [vmem:[#allocation2 + $0x41] sm:$0xff] %vm445_vm3, %v415_v38  ;;  %v1704_v57 = vld [vmem:[%s2095_s30 + $0x81] sm:$0xff]  ;;  %v859_v62 = vld [vmem:[%s2700_s1 + $0x30] sm:$0xff]  ;;  %s1987_s30 = smov 56  }
  0x2c   : > { %v385_v48 = vmax.f32 %v368_v43, %v1687_v12  ;;  %450 = vst.msk [vmem:[#allocation2 + $0x51] sm:$0xff] %vm445_vm3, %v416_v46  ;;  %601 = vrot.lane.b32.xlu1 %v2179_v50, %s1983_s10  ;;  %v487_v58 = vld [vmem:[#allocation2 + $0x21] sm:$0xff]  ;;  %v855_v6 = vld [vmem:[%s2700_s1 + $0x10] sm:$0xff] }
  0x2d   : > { %v353_v32 = vmax.f32 %v336_v37, %v1672_v35  ;;  %v401_v47 = vmax.f32 %v384_v42, %v2147_v56  ;;  %599 = vrot.lane.b32.xlu0 %v2181_v51, %s1983_s10  ;;  %v861_v60 = vld [vmem:[%s2700_s1 + $0x40] sm:$0xff]  ;;  %v2293_v29 = vld [vmem:[#allocation2 + $0x90] sm:$0xff] }
  0x2e   : > { %v402_v53 = vmax.f32 %v385_v48, %v1695_v13  ;;  %1745 = vmatprep.subr.mxu0 %v861_v60  ;;  %v465_v2 = vld [vmem:[#allocation2 + $0x31] sm:$0xff]  ;;  %v857_v3 = vld [vmem:[%s2700_s1 + $0x20] sm:$0xff] }
  0x2f   : > { %v369_v49 = vmax.f32 %v353_v32, %v1680_v39  ;;  %v417_v52 = vmax.f32 %v401_v47, %v1702_v63  ;;  %1746 = vmatpush3.msra.mxu0 %v861_v60  ;;  %v495_v63 = vld [vmem:[#allocation2 + $0x22] sm:$0xff]  ;;  %v2219_v5 = vld [vmem:[#allocation2 + $0x30] sm:$0xff] }
  0x30   : > { %v418_v54 = vmax.f32 %v402_v53, %v1703_v23  ;;  %633 = vrot.lane.b32.xlu1 %v487_v58, %s1984_s13  ;;  %1747 = vmatprep.subr.mxu0 %v860_v61  ;;  %v473_v7 = vld [vmem:[#allocation2 + $0x32] sm:$0xff]  ;;  %v853_v9 = vld [vmem:[%s2700_s1] sm:$0xff] }
  0x31   : > { %v386_v55 = vmax.f32 %v369_v49, %v1688_v34  ;;  %451 = vst.msk [vmem:[#allocation2 + $0x61] sm:$0xff] %vm445_vm3, %v417_v52  ;;  %631 = vrot.lane.b32.xlu0 %v463_v45, %s1984_s13  ;;  %1748 = vmatpush3.msra.mxu0 %v860_v61  ;;  %v2298_v30 = vld [vmem:[#allocation2 + $0x91] sm:$0xff]  ;;  %v454_v34 = vld [vmem:[#allocation2] sm:$0xff] }
  0x32   : > { %452 = vst.msk [vmem:[#allocation2 + $0x71] sm:$0xff] %vm445_vm3, %v418_v54  ;;  %1749 = vmatprep.subr.mxu0 %v859_v62  ;;  %v2238_v11 = vld [vmem:[#allocation2 + $0x40] sm:$0xff]  ;;  %v526_v35 = vld [vmem:[#allocation2 + $0x92] sm:$0xff] }
  0x33   : > { %v403_v56 = vmax.f32 %v386_v55, %v1696_v40  ;;  %1750 = vmatpush3.msra.mxu0 %v859_v62  ;;  %v489_v12 = vld [vmem:[#allocation2 + $0x41] sm:$0xff]  ;;  %v2248_v14 = vld [vmem:[#allocation2 + $0x50] sm:$0xff] }
  0x34   : > { %539 = vrot.lane.b32.xlu1 %v487_v58, %s1982_s9  ;;  %1751 = vmatprep.subr.mxu0 %v858_v1  ;;  %v497_v13 = vld [vmem:[#allocation2 + $0x42] sm:$0xff]  ;;  %v514_v15 = vld [vmem:[#allocation2 + $0x51] sm:$0xff] }
  0x35   : > { %v419_v59 = vmax.f32 %v403_v56, %v1704_v57  ;;  %663 = vrot.lane.b32.xlu0 %v471_v44, %s1985_s16  ;;  %1752 = vmatpush3.msra.mxu0 %v858_v1  ;;  %v522_v17 = vld [vmem:[#allocation2 + $0x52] sm:$0xff] }
  0x36   : > { %1753 = vmatprep.subr.mxu0 %v857_v3 }
  0x37   : > { %453 = vst.msk [vmem:[#allocation2 + $0x81] sm:$0xff] %vm445_vm3, %v419_v59  ;;  %1754 = vmatpush3.msra.mxu0 %v857_v3 }
  0x38   : > { %695 = vrot.lane.b32.xlu1 %v2179_v50, %s1986_s21  ;;  %1755 = vmatprep.subr.mxu0 %v856_v4  ;;  %v2262_v18 = vld [vmem:[#allocation2 + $0x60] sm:$0xff] }
  0x39   : > { %665 = vrot.lane.b32.xlu0 %v495_v63, %s1985_s16  ;;  %1756 = vmatpush3.msra.mxu0 %v856_v4  ;;  %v491_v19 = vld [vmem:[#allocation2 + $0x61] sm:$0xff]  ;;  %v2272_v20 = vld [vmem:[#allocation2 + $0x70] sm:$0xff] }
  0x3a   : > { %1757 = vmatprep.subr.mxu0 %v855_v6  ;;  %v499_v10 = vld [vmem:[#allocation2 + $0x62] sm:$0xff]  ;;  %v516_v16 = vld [vmem:[#allocation2 + $0x71] sm:$0xff] }
  0x3b   : > { %1758 = vmatpush3.msra.mxu0 %v855_v6  ;;  %v524_v22 = vld [vmem:[#allocation2 + $0x72] sm:$0xff] }
  0x3c   : > { %571 = vrot.lane.b32.xlu1 %v495_v63, %s1981_s8  ;;  %1759 = vmatprep.subr.mxu0 %v854_v8 }
  0x3d   : > { %541 = vrot.lane.b32.xlu0 %v465_v2, %s1982_s9  ;;  %1760 = vmatpush3.msra.mxu0 %v854_v8 }
  0x3e   : > { %1761 = vmatprep.subr.mxu0 %v853_v9  ;;  %v485_v23 = vld [vmem:[#allocation2 + $0x80] sm:$0xff] }
  0x3f   : > { %1762 = vmatpush3.msra.mxu0 %v853_v9  ;;  %v493_v24 = vld [vmem:[#allocation2 + $0x81] sm:$0xff] }
  0x40   : > { %727 = vrot.lane.b32.xlu1 %v487_v58, %s1987_s30  ;;  %1435 = vmatprep.subr.mxu0 %v1980_v0  ;;  %v501_v26 = vld [vmem:[#allocation2 + $0x82] sm:$0xff] }
  0x41   : > { %697 = vrot.lane.b32.xlu0 %v2219_v5, %s1986_s21 }
  0x44   : > { %603 = vrot.lane.b32.xlu1 %v2219_v5, %s1983_s10 }
  0x45   : > { %573 = vrot.lane.b32.xlu0 %v473_v7, %s1981_s8 }
  0x48   : > { %759 = vrot.lane.b32.xlu1 %v495_v63, %s1988_s17 }
  0x49   : > { %729 = vrot.lane.b32.xlu0 %v465_v2, %s1987_s30 }
  0x4c   : > { %635 = vrot.lane.b32.xlu1 %v465_v2, %s1984_s13 }
  0x4d   : > { %605 = vrot.lane.b32.xlu0 %v2238_v11, %s1983_s10 }
  0x50   : > { %637 = vrot.lane.b32.xlu1 %v489_v12, %s1984_s13 }
  0x51   : > { %761 = vrot.lane.b32.xlu0 %v473_v7, %s1988_s17 }
  0x54   : > { %669 = vrot.lane.b32.xlu1 %v497_v13, %s1985_s16 }
  0x55   : > { %667 = vrot.lane.b32.xlu0 %v473_v7, %s1985_s16 }
  0x58   : > { %701 = vrot.lane.b32.xlu1 %v2248_v14, %s1986_s21 }
  0x59   : > { %699 = vrot.lane.b32.xlu0 %v2238_v11, %s1986_s21 }
  0x5c   : > { %733 = vrot.lane.b32.xlu1 %v514_v15, %s1987_s30 }
  0x5d   : > { %731 = vrot.lane.b32.xlu0 %v489_v12, %s1987_s30 }
  0x60   : > { %543 = vrot.lane.b32.xlu1 %v489_v12, %s1982_s9 }
  0x61   : > { %763 = vrot.lane.b32.xlu0 %v497_v13, %s1988_s17 }
  0x64   : > { %545 = vrot.lane.b32.xlu1 %v514_v15, %s1982_s9 }
  0x65   : > { %765 = vrot.lane.b32.xlu0 %v522_v17, %s1988_s17 }
  0x68   : > { %577 = vrot.lane.b32.xlu1 %v522_v17, %s1981_s8 }
  0x69   : > { %575 = vrot.lane.b32.xlu0 %v497_v13, %s1981_s8 }
  0x6c   : > { %609 = vrot.lane.b32.xlu1 %v2262_v18, %s1983_s10 }
  0x6d   : > { %607 = vrot.lane.b32.xlu0 %v2248_v14, %s1983_s10 }
  0x70   : > { %641 = vrot.lane.b32.xlu1 %v491_v19, %s1984_s13 }
  0x71   : > { %639 = vrot.lane.b32.xlu0 %v514_v15, %s1984_s13 }
  0x74   : > { %673 = vrot.lane.b32.xlu1 %v499_v10, %s1985_s16 }
  0x75   : > { %671 = vrot.lane.b32.xlu0 %v522_v17, %s1985_s16 }
  0x78   : > { %705 = vrot.lane.b32.xlu1 %v2272_v20, %s1986_s21 }
  0x79   : > { %703 = vrot.lane.b32.xlu0 %v2262_v18, %s1986_s21 }
  0x7c   : > { %737 = vrot.lane.b32.xlu1 %v516_v16, %s1987_s30 }
  0x7d   : > { %735 = vrot.lane.b32.xlu0 %v491_v19, %s1987_s30 }
  0x80   : > { %547 = vrot.lane.b32.xlu1 %v491_v19, %s1982_s9 }
  0x81   : > { %767 = vrot.lane.b32.xlu0 %v499_v10, %s1988_s17 }
  0x84   : > { %549 = vrot.lane.b32.xlu1 %v516_v16, %s1982_s9 }
  0x85   : > { %769 = vrot.lane.b32.xlu0 %v524_v22, %s1988_s17 }
  0x87   : > { %v568_v27 = vpop.permute.xlu1 %567 }
  0x88   : > { %581 = vrot.lane.b32.xlu1 %v524_v22, %s1981_s8  ;;  %v536_v28 = vpop.permute.xlu0 %535 }
  0x89   : > { %579 = vrot.lane.b32.xlu0 %v499_v10, %s1981_s8  ;;  %v783_v44 = vsel %vm445_vm3, %v454_v34, %v536_v28 }
  0x8a   : > { %v791_v47 = vsel %vm420_vm0, %v783_v44, %v568_v27 }
  0x8c   : > { %613 = vrot.lane.b32.xlu1 %v485_v23, %s1983_s10 }
  0x8d   : > { %611 = vrot.lane.b32.xlu0 %v2272_v20, %s1983_s10 }
  0x90   : > { %645 = vrot.lane.b32.xlu1 %v493_v24, %s1984_s13 }
  0x91   : > { %643 = vrot.lane.b32.xlu0 %v516_v16, %s1984_s13 }
  0x94   : > { %677 = vrot.lane.b32.xlu1 %v501_v26, %s1985_s16 }
  0x95   : > { %675 = vrot.lane.b32.xlu0 %v524_v22, %s1985_s16 }
  0x98   : > { %709 = vrot.lane.b32.xlu1 %v2293_v29, %s1986_s21 }
  0x99   : > { %707 = vrot.lane.b32.xlu0 %v485_v23, %s1986_s21 }
  0x9a   : > { %v570_v31 = vpop.permute.xlu1 %569 }
  0x9b   : > { %v538_v33 = vpop.permute.xlu0 %537 }
  0x9c   : > { %741 = vrot.lane.b32.xlu1 %v2298_v30, %s1987_s30  ;;  %v784_v57 = vsel %vm445_vm3, %v2181_v51, %v538_v33 }
  0x9d   : > { %739 = vrot.lane.b32.xlu0 %v493_v24, %s1987_s30  ;;  %v792_v60 = vsel %vm420_vm0, %v784_v57, %v570_v31  ;;  %s2686_s30 = scalar_lea.vmem %s2706_s7, %s1727_s27 }
  0x9e   : > { %v602_v21 = vpop.permute.xlu1 %601 }
  0x9f   : > { %v600_v36 = vpop.permute.xlu0 %599  ;;  %v801_v61 = vsel %vm799_vm4, %v792_v60, %v602_v21 }
  0xa0   : > { %773 = vrot.lane.b32.xlu1 %v526_v35, %s1988_s17  ;;  %v800_v48 = vsel %vm799_vm4, %v791_v47, %v600_v36 }
  0xa1   : > { %771 = vrot.lane.b32.xlu0 %v501_v26, %s1988_s17 }
  0xa2   : > { %v634_v25 = vpop.permute.xlu1 %633 }
  0xa3   : > { %v632_v37 = vpop.permute.xlu0 %631  ;;  %v810_v1 = vsel %vm808_vm5, %v801_v61, %v634_v25 }
  0xa4   : > { %v809_v52 = vsel %vm808_vm5, %v800_v48, %v632_v37 }
  0xa6   : > { %v540_v38 = vpop.permute.xlu1 %539 }
  0xa7   : > { %v664_v39 = vpop.permute.xlu0 %663  ;;  %v785_v15 = vsel %vm445_vm3, %v2179_v50, %v540_v38 }
  0xa8   : > { %v818_v53 = vsel %vm817_vm6, %v809_v52, %v664_v39 }
  0xaa   : > { %v696_v41 = vpop.permute.xlu1 %695 }
  0xab   : > { %v666_v42 = vpop.permute.xlu0 %665  ;;  %v827_v55 = vsel %vm826_vm7, %v818_v53, %v696_v41 }
  0xac   : > { %v819_v2 = vsel %vm817_vm6, %v810_v1, %v666_v42 }
  0xae   : > { %v572_v43 = vpop.permute.xlu1 %571 }
  0xaf   : > { %v542_v32 = vpop.permute.xlu0 %541  ;;  %v793_v17 = vsel %vm420_vm0, %v785_v15, %v572_v43 }
  0xb0   : > { %v786_v23 = vsel %vm445_vm3, %v2219_v5, %v542_v32 }
  0xb2   : > { %v728_v45 = vpop.permute.xlu1 %727 }
  0xb3   : > { %v698_v46 = vpop.permute.xlu0 %697  ;;  %v836_v54 = vsel %vm835_vm8, %v827_v55, %v728_v45 }
  0xb4   : > { %v828_v51 = vsel %vm826_vm7, %v819_v2, %v698_v46 }
  0xb6   : > { %v604_v49 = vpop.permute.xlu1 %603 }
  0xb7   : > { %v574_v40 = vpop.permute.xlu0 %573  ;;  %v802_v19 = vsel %vm799_vm4, %v793_v17, %v604_v49 }
  0xb8   : > { %v794_v26 = vsel %vm420_vm0, %v786_v23, %v574_v40 }
  0xba   : > { %v760_v56 = vpop.permute.xlu1 %759 }
  0xbb   : > { %v730_v58 = vpop.permute.xlu0 %729  ;;  %v845_v59 = vsel %vm844_vm9, %v836_v54, %v760_v56 }
  0xbc   : > { %1763 = vmatprep.mubr.msk.f32.mxu0 %vm862_vm10, %v845_v59  ;;  %v837_v3 = vsel %vm835_vm8, %v828_v51, %v730_v58 }
  0xbe   : > { %v636_v62 = vpop.permute.xlu1 %635 }
  0xbf   : > { %v606_v63 = vpop.permute.xlu0 %605  ;;  %v811_v22 = vsel %vm808_vm5, %v802_v19, %v636_v62 }
  0xc0   : > { %v803_v28 = vsel %vm799_vm4, %v794_v26, %v606_v63 }
  0xc2   : > { %v638_v4 = vpop.permute.xlu1 %637 }
  0xc3   : > { %v762_v6 = vpop.permute.xlu0 %761  ;;  %v812_v35 = vsel %vm808_vm5, %v803_v28, %v638_v4 }
  0xc4   : > { %v846_v7 = vsel %vm844_vm9, %v837_v3, %v762_v6 }
  0xc5   : > { %1764 = vmatmul.mubr.msk.f32.vlgmr.msra.gmra.mxu0 %vm862_vm10, %v846_v7 }
  0xc6   : > { %v670_v8 = vpop.permute.xlu1 %669 }
  0xc7   : > { %v668_v9 = vpop.permute.xlu0 %667  ;;  %v821_v36 = vsel %vm817_vm6, %v812_v35, %v670_v8 }
  0xc8   : > { %v820_v24 = vsel %vm817_vm6, %v811_v22, %v668_v9 }
  0xca   : > { %v702_v12 = vpop.permute.xlu1 %701 }
  0xcb   : > { %v700_v13 = vpop.permute.xlu0 %699  ;;  %v830_v5 = vsel %vm826_vm7, %v821_v36, %v702_v12 }
  0xcc   : > { %v829_v27 = vsel %vm826_vm7, %v820_v24, %v700_v13 }
  0xce   : > { %v734_v10 = vpop.permute.xlu1 %733 }
  0xcf   : > { %v732_v16 = vpop.permute.xlu0 %731  ;;  %v839_v25 = vsel %vm835_vm8, %v830_v5, %v734_v10 }
  0xd0   : > { %v838_v50 = vsel %vm835_vm8, %v829_v27, %v732_v16 }
  0xd2   : > { %v544_v31 = vpop.permute.xlu1 %543 }
  0xd3   : > { %v764_v33 = vpop.permute.xlu0 %763  ;;  %v787_v49 = vsel %vm445_vm3, %v2238_v11, %v544_v31 }
  0xd4   : > { %v847_v21 = vsel %vm844_vm9, %v838_v50, %v764_v33 }
  0xd5   : > { %1766 = vmatprep.mubr.msk.f32.mxu0 %vm862_vm10, %v847_v21 }
  0xd6   : > { %v546_v37 = vpop.permute.xlu1 %545 }
  0xd7   : > { %v766_v38 = vpop.permute.xlu0 %765  ;;  %v788_v54 = vsel %vm445_vm3, %v2248_v14, %v546_v37 }
  0xd8   : > { %v848_v39 = vsel %vm844_vm9, %v839_v25, %v766_v38 }
  0xd9   : > { %1767 = vmatmul.mubr.msk.f32.gmra.mxu0 %vm862_vm10, %v848_v39 }
  0xda   : > { %v578_v41 = vpop.permute.xlu1 %577 }
  0xdb   : > { %v576_v42 = vpop.permute.xlu0 %575  ;;  %v796_v58 = vsel %vm420_vm0, %v788_v54, %v578_v41  ;;  %v1403_v54 = vld [vmem:[%s2703_s4 + $0x50] sm:$0xff] }
  0xdc   : > { %v795_v40 = vsel %vm420_vm0, %v787_v49, %v576_v42  ;;  %v1408_v42 = vld [vmem:[%s2703_s4 + $0x78] sm:$0xff] }
  0xdd   : > { %1793 = vmatpush1.msra.mxu1 %v1408_v42  ;;  %1436 = vmatpush1.msra.mxu0 %v1408_v42 }
  0xde   : > { %v610_v43 = vpop.permute.xlu1 %609  ;;  %1776 = vmatprep.subr.mxu1 %v1980_v0  ;;  %1437 = vmatprep.subr.mxu0 %v1980_v0 }
  0xdf   : > { %v608_v32 = vpop.permute.xlu0 %607  ;;  %v805_v60 = vsel %vm799_vm4, %v796_v58, %v610_v43  ;;  %v1407_v43 = vld [vmem:[%s2703_s4 + $0x70] sm:$0xff] }
  0xe0   : > { %v804_v52 = vsel %vm799_vm4, %v795_v40, %v608_v32  ;;  %1794 = vmatpush1.msra.mxu1 %v1407_v43  ;;  %1438 = vmatpush1.msra.mxu0 %v1407_v43  ;;  %v2397_v32 = vld [vmem:[%s2701_s2] ss:$0 sm:$0xff] }
  0xe1   : > { %1777 = vmatprep.subr.mxu1 %v1980_v0  ;;  %1439 = vmatprep.subr.mxu0 %v1980_v0 }
  0xe2   : > { %v642_v34 = vpop.permute.xlu1 %641 }
  0xe3   : > { %v640_v44 = vpop.permute.xlu0 %639  ;;  %v814_v63 = vsel %vm808_vm5, %v805_v60, %v642_v34 }
  0xe4   : > { %v813_v57 = vsel %vm808_vm5, %v804_v52, %v640_v44  ;;  %v2402_v44 = vld [vmem:[%s2702_s3] ss:$0 sm:$0xff]  ;;  %v1406_v52 = vld [vmem:[%s2703_s4 + $0x68] sm:$0xff] }
  0xe5   : > { %1795 = vmatpush1.msra.mxu1 %v1406_v52  ;;  %1440 = vmatpush1.msra.mxu0 %v1406_v52 }
  0xe6   : > { %v674_v45 = vpop.permute.xlu1 %673  ;;  %1778 = vmatprep.subr.mxu1 %v1980_v0  ;;  %1441 = vmatprep.subr.mxu0 %v1980_v0 }
  0xe7   : > { %v672_v46 = vpop.permute.xlu0 %671  ;;  %v823_v2 = vsel %vm817_vm6, %v814_v63, %v674_v45 }
  0xe8   : > { %v822_v56 = vsel %vm817_vm6, %v813_v57, %v672_v46  ;;  %v1404_v57 = vld [vmem:[%s2703_s4 + $0x58] sm:$0xff] }
  0xea   : > { %v706_v47 = vpop.permute.xlu1 %705 }
  0xeb   : > { %v704_v48 = vpop.permute.xlu0 %703  ;;  %v832_v14 = vsel %vm826_vm7, %v823_v2, %v706_v47  ;;  %v1399_v2 = vld [vmem:[%s2703_s4 + $0x30] sm:$0xff] }
  0xec   : > { %v831_v59 = vsel %vm826_vm7, %v822_v56, %v704_v48  ;;  %v1402_v56 = vld [vmem:[%s2703_s4 + $0x48] sm:$0xff] }
  0xee   : > { %v738_v53 = vpop.permute.xlu1 %737 }
  0xef   : > { %v736_v55 = vpop.permute.xlu0 %735  ;;  %v841_v51 = vsel %vm835_vm8, %v832_v14, %v738_v53 }
  0xf0   : > { %v840_v11 = vsel %vm835_vm8, %v831_v59, %v736_v55  ;;  %v1405_v55 = vld [vmem:[%s2703_s4 + $0x60] sm:$0xff] }
  0xf1   : > { %1796 = vmatpush1.msra.mxu1 %v1405_v55  ;;  %1442 = vmatpush1.msra.mxu0 %v1405_v55  ;;  %v1401_v59 = vld [vmem:[%s2703_s4 + $0x40] sm:$0xff] }
  0xf2   : > { %v548_v61 = vpop.permute.xlu1 %547  ;;  %1779 = vmatprep.subr.mxu1 %v1980_v0  ;;  %1443 = vmatprep.subr.mxu0 %v1980_v0 }
  0xf3   : > { %v768_v62 = vpop.permute.xlu0 %767  ;;  %v789_v22 = vsel %vm445_vm3, %v2262_v18, %v548_v61  ;;  %1797 = vmatpush1.msra.mxu1 %v1404_v57  ;;  %1444 = vmatpush1.msra.mxu0 %v1404_v57 }
  0xf4   : > { %v849_v1 = vsel %vm844_vm9, %v840_v11, %v768_v62  ;;  %1780 = vmatprep.subr.mxu1 %v1980_v0  ;;  %1445 = vmatprep.subr.mxu0 %v1980_v0 }
  0xf5   : > { %1769 = vmatprep.mubr.msk.f32.mxu0 %vm862_vm10, %v849_v1  ;;  %1798 = vmatpush1.msra.mxu1 %v1403_v54  ;;  %v1400_v1 = vld [vmem:[%s2703_s4 + $0x38] sm:$0xff] }
  0xf6   : > { %v550_v3 = vpop.permute.xlu1 %549  ;;  %1446 = vmatpush1.msra.mxu0 %v1403_v54  ;;  %1781 = vmatprep.subr.mxu1 %v1980_v0 }
  0xf7   : > { %v770_v4 = vpop.permute.xlu0 %769  ;;  %v790_v23 = vsel %vm445_vm3, %v2272_v20, %v550_v3  ;;  %1447 = vmatprep.subr.mxu0 %v1980_v0  ;;  %1799 = vmatpush1.msra.mxu1 %v1402_v56  ;;  %v1398_v3 = vld [vmem:[%s2703_s4 + $0x28] sm:$0xff] }
  0xf8   : > { %v850_v6 = vsel %vm844_vm9, %v841_v51, %v770_v4  ;;  %1782 = vmatprep.subr.mxu1 %v1980_v0  ;;  %1448 = vmatpush1.msra.mxu0 %v1402_v56 }
  0xf9   : > { %1770 = vmatmul.mubr.msk.f32.gmra.mxu0 %vm862_vm10, %v850_v6  ;;  %1800 = vmatpush1.msra.mxu1 %v1401_v59 }
  0xfa   : > { %v582_v7 = vpop.permute.xlu1 %581  ;;  %1449 = vmatprep.subr.mxu0 %v1980_v0  ;;  %1783 = vmatprep.subr.mxu1 %v1980_v0 }
  0xfb   : > { %v580_v8 = vpop.permute.xlu0 %579  ;;  %v798_v24 = vsel %vm420_vm0, %v790_v23, %v582_v7  ;;  %1450 = vmatpush1.msra.mxu0 %v1401_v59  ;;  %1801 = vmatpush1.msra.mxu1 %v1400_v1 }
  0xfc   : > { %v797_v26 = vsel %vm420_vm0, %v789_v22, %v580_v8  ;;  %1451 = vmatprep.subr.mxu0 %v1980_v0  ;;  %1784 = vmatprep.subr.mxu1 %v1980_v0  ;;  %v1397_v8 = vld [vmem:[%s2703_s4 + $0x20] sm:$0xff]  ;;  %v1410_v22 = vld [vmem:[%s2703_s4 + $0x88] sm:$0xff] }
  0xfd   : > { %1452 = vmatpush1.msra.mxu0 %v1400_v1  ;;  %1802 = vmatpush1.msra.mxu1 %v1399_v2 }
  0xfe   : > { %v614_v9 = vpop.permute.xlu1 %613  ;;  %1453 = vmatprep.subr.mxu0 %v1980_v0  ;;  %1785 = vmatprep.subr.mxu1 %v1980_v0 }
  0xff   : > { %v612_v12 = vpop.permute.xlu0 %611  ;;  %v807_v27 = vsel %vm799_vm4, %v798_v24, %v614_v9  ;;  %1454 = vmatpush1.msra.mxu0 %v1399_v2  ;;  %1803 = vmatpush1.msra.mxu1 %v1398_v3 }
 0x100   : > { %v806_v28 = vsel %vm799_vm4, %v797_v26, %v612_v12  ;;  %1455 = vmatprep.subr.mxu0 %v1980_v0  ;;  %1786 = vmatprep.subr.mxu1 %v1980_v0 }
 0x101   : > { %1456 = vmatpush1.msra.mxu0 %v1398_v3  ;;  %1804 = vmatpush1.msra.mxu1 %v1397_v8 }
 0x102   : > { %v646_v13 = vpop.permute.xlu1 %645  ;;  %1457 = vmatprep.subr.mxu0 %v1980_v0  ;;  %1787 = vmatprep.subr.mxu1 %v1980_v0 }
 0x103   : > { %v644_v15 = vpop.permute.xlu0 %643  ;;  %v816_v33 = vsel %vm808_vm5, %v807_v27, %v646_v13  ;;  %v1396_v13 = vld [vmem:[%s2703_s4 + $0x18] sm:$0xff]  ;;  %1458 = vmatpush1.msra.mxu0 %v1397_v8 }
 0x104   : > { %v815_v35 = vsel %vm808_vm5, %v806_v28, %v644_v15  ;;  %1805 = vmatpush1.msra.mxu1 %v1396_v13  ;;  %1459 = vmatprep.subr.mxu0 %v1980_v0 }
 0x105   : > { %1788 = vmatprep.subr.mxu1 %v1980_v0  ;;  %1460 = vmatpush1.msra.mxu0 %v1396_v13  ;;  %v1046_v13 = vld [vmem:[#allocation2 + $0x1] sm:$0xff] }
 0x106   : > { %v678_v17 = vpop.permute.xlu1 %677  ;;  %1461 = vmatprep.subr.mxu0 %v1980_v0 }
 0x107   : > { %v676_v19 = vpop.permute.xlu0 %675  ;;  %v825_v21 = vsel %vm817_vm6, %v816_v33, %v678_v17  ;;  %v1395_v17 = vld [vmem:[%s2703_s4 + $0x10] sm:$0xff] }
 0x108   : > { %v824_v18 = vsel %vm817_vm6, %v815_v35, %v676_v19  ;;  %1806 = vmatpush1.msra.mxu1 %v1395_v17  ;;  %v1394_v19 = vld [vmem:[%s2703_s4 + $0x8] sm:$0xff]  ;;  %1462 = vmatpush1.msra.mxu0 %v1395_v17 }
 0x109   : > { %1789 = vmatprep.subr.mxu1 %v1980_v0  ;;  %1463 = vmatprep.subr.mxu0 %v1980_v0 }
 0x10a   : > { %v710_v10 = vpop.permute.xlu1 %709  ;;  %1807 = vmatpush1.msra.mxu1 %v1394_v19  ;;  %1464 = vmatpush1.msra.mxu0 %v1394_v19  ;;  %v1054_v19 = vld [vmem:[#allocation2 + $0x2] sm:$0xff] }
 0x10b   : > { %v708_v16 = vpop.permute.xlu0 %707  ;;  %v834_v20 = vsel %vm826_vm7, %v825_v21, %v710_v10  ;;  %v1393_v10 = vld [vmem:[%s2703_s4] sm:$0xff]  ;;  %1790 = vmatprep.subr.mxu1 %v1980_v0  ;;  %1465 = vmatprep.subr.mxu0 %v1980_v0 }
 0x10c   : > { %v833_v36 = vsel %vm826_vm7, %v824_v18, %v708_v16  ;;  %1808 = vmatpush1.msra.mxu1 %v1393_v10  ;;  %1466 = vmatpush1.msra.mxu0 %v1393_v10 }
 0x10d   : > { %1791 = vmatprep.subr.mxu1 %v1980_v0  ;;  %1495 = vmatprep.subr.mxu0 %v1980_v0 }
 0x10e   : > { %v742_v50 = vpop.permute.xlu1 %741  ;;  %1809 = vmatpush2.msra.mxu1 %v1410_v22  ;;  %1496 = vmatpush2.msra.mxu0 %v1410_v22 }
 0x10f   : > { %v740_v31 = vpop.permute.xlu0 %739  ;;  %v843_v5 = vsel %vm835_vm8, %v834_v20, %v742_v50  ;;  %v1409_v50 = vld [vmem:[%s2703_s4 + $0x80] sm:$0xff]  ;;  %1792 = vmatprep.subr.mxu1 %v1980_v0  ;;  %1497 = vmatprep.subr.mxu0 %v1980_v0 }
 0x110   : > { %v842_v25 = vsel %vm835_vm8, %v833_v36, %v740_v31  ;;  %1810 = vmatpush2.msra.mxu1 %v1409_v50  ;;  %1498 = vmatpush2.msra.mxu0 %v1409_v50 }
 0x112   : > { %v774_v37 = vpop.permute.xlu1 %773 }
 0x113   : > { %v772_v38 = vpop.permute.xlu0 %771  ;;  %v852_v39 = vsel %vm844_vm9, %v843_v5, %v774_v37 }
 0x114   : > { %v851_v41 = vsel %vm844_vm9, %v842_v25, %v772_v38 }
 0x115   : > { %1772 = vmatprep.mubr.msk.f32.mxu0 %vm862_vm10, %v851_v41 }
 0x116   : > { %1773 = vmatmul.mubr.msk.f32.gmra.mxu0 %vm862_vm10, %v852_v39 }
 0x185   : > { %v1765_v34 = vpop.f32.mrf.mxu0 }
 0x186   : > { %v1000_v45 = vmul.f32 %v1765_v34, %v2397_v32 }
 0x187   : > { %v953_v46 = vpop.f32.mrf.mxu0 }
 0x188   : > { %v1015_v47 = vadd.f32 %v2402_v44, %v1000_v45  ;;  %v999_v48 = vmul.f32 %v2397_v32, %v953_v46 }
 0x18a   : > { %v1023_v49 = vmax.f32 %v1015_v47, 0.0  ;;  %v1014_v40 = vadd.f32 %v2402_v44, %v999_v48 }
 0x18c   : > { %1031 = vst.msk [vmem:[#allocation2 + $0x21] sm:$0xff] %vm420_vm0, %v1023_v49  ;;  %v1022_v53 = vmax.f32 %v1014_v40, 0.0 }
 0x18e   : > { %1030 = vst.msk [vmem:[#allocation2 + $0x11] sm:$0xff] %vm420_vm0, %v1022_v53 }
 0x193   : > { %v2431_v58 = vld [vmem:[#allocation2 + $0x22] sm:$0xff] }
 0x194   : > { %1715 = vmatprep.mubr.msk.f32.mxu0 %vm420_vm0, %v2431_v58  ;;  %v2444_v61 = vld [vmem:[#allocation2 + $0x21] sm:$0xff] }
 0x195   : > { %v2440_v60 = vld [vmem:[#allocation2 + $0x12] sm:$0xff]  ;;  %v2500_v16 = vld [vmem:[#allocation2 + $0x20] sm:$0xff] }
 0x196   : > { %v2442_v11 = vld [vmem:[#allocation2 + $0x11] sm:$0xff]  ;;  %v1837_v62 = vpack.i.bf16 %v2431_v58, %v2440_v60 }
 0x197   : > { %v1832_v63 = vpack.i.bf16 %v2444_v61, %v2442_v11 }
 0x198   : > { %1838 = vrot.lane.b32.xlu1 %v1837_v62, %s1984_s13 }
 0x199   : > { %1833 = vrot.lane.b32.xlu0 %v1832_v63, %s1981_s8  ;;  %v1768_v14 = vpop.f32.mrf.mxu0 }
 0x19a   : > { %v1002_v51 = vmul.f32 %v1768_v14, %v2397_v32 }
 0x19b   : > { %v963_v4 = vpop.f32.mrf.mxu0 }
 0x19c   : > { %v1017_v6 = vadd.f32 %v2402_v44, %v1002_v51  ;;  %v1001_v7 = vmul.f32 %v2397_v32, %v963_v4  ;;  %v1062_v51 = vld [vmem:[#allocation2 + $0x10] sm:$0xff] }
 0x19e   : > { %v1025_v9 = vmax.f32 %v1017_v6, 0.0  ;;  %v1016_v12 = vadd.f32 %v2402_v44, %v1001_v7 }
 0x1a0   : > { %1033 = vst.msk [vmem:[#allocation2 + $0x41] sm:$0xff] %vm420_vm0, %v1025_v9  ;;  %v1024_v15 = vmax.f32 %v1016_v12, 0.0 }
 0x1a2   : > { %1032 = vst.msk [vmem:[#allocation2 + $0x31] sm:$0xff] %vm420_vm0, %v1024_v15 }
 0x1a7   : > { %v2519_v31 = vld [vmem:[#allocation2 + $0x40] sm:$0xff] }
 0x1a8   : > { %v1096_v21 = vld [vmem:[#allocation2 + $0x41] sm:$0xff] }
 0x1a9   : > { %v1103_v23 = vld [vmem:[#allocation2 + $0x32] sm:$0xff]  ;;  %v2529_v0 = vld [vmem:[#allocation2 + $0x42] sm:$0xff] }
 0x1aa   : > { %v1072_v24 = vld [vmem:[#allocation2 + $0x31] sm:$0xff]  ;;  %1716 = vmatprep.mubr.msk.f32.mxu1 %vm420_vm0, %v1103_v23  ;;  %v1852_v35 = vpack.i.bf16 %v1103_v23, %v2431_v58  ;;  %v1872_v20 = vpack.i.bf16 %v2529_v0, %v1103_v23 }
 0x1ab   : > { %v2506_v26 = vld [vmem:[#allocation2 + $0x30] sm:$0xff]  ;;  %v1847_v27 = vpack.i.bf16 %v1072_v24, %v2444_v61  ;;  %v1862_v18 = vpack.i.bf16 %v1096_v21, %v1072_v24  ;;  %v1962_v24 = vpack.i.bf16 %v2293_v29, %v2500_v16 }
 0x1ac   : > { %v1842_v28 = vpack.i.bf16 %v2506_v26, %v2500_v16  ;;  %v1857_v33 = vpack.i.bf16 %v2519_v31, %v2506_v26 }
 0x1ad   : > { %1848 = vrot.lane.b32.xlu1 %v1847_v27, %s1988_s17  ;;  %v1967_v27 = vpack.i.bf16 %v2298_v30, %v2444_v61 }
 0x1ae   : > { %1843 = vrot.lane.b32.xlu0 %v1842_v28, %s1986_s21 }
 0x1b1   : > { %1858 = vrot.lane.b32.xlu1 %v1857_v33, %s1989_s22 }
 0x1b2   : > { %1853 = vrot.lane.b32.xlu0 %v1852_v35, %s1990_s23 }
 0x1b5   : > { %1868 = vrot.lane.b32.xlu1 %v1862_v18, %s1981_s8 }
 0x1b6   : > { %1863 = vrot.lane.b32.xlu0 %v1862_v18, %s1991_s26 }
 0x1b9   : > { %v1771_v36 = vpop.f32.mrf.mxu0 }
 0x1ba   : > { %1873 = vrot.lane.b32.xlu0 %v1872_v20, %s1984_s13  ;;  %v1004_v5 = vmul.f32 %v1771_v36, %v2397_v32 }
 0x1bb   : > { %v973_v25 = vpop.f32.mrf.mxu0 }
 0x1bc   : > { %v1019_v37 = vadd.f32 %v2402_v44, %v1004_v5  ;;  %v1003_v38 = vmul.f32 %v2397_v32, %v973_v25 }
 0x1be   : > { %v1027_v39 = vmax.f32 %v1019_v37, 0.0  ;;  %v1018_v41 = vadd.f32 %v2402_v44, %v1003_v38 }
 0x1c0   : > { %1035 = vst.msk [vmem:[#allocation2 + $0x61] sm:$0xff] %vm420_vm0, %v1027_v39  ;;  %v1026_v42 = vmax.f32 %v1018_v41, 0.0 }
 0x1c2   : > { %1034 = vst.msk [vmem:[#allocation2 + $0x51] sm:$0xff] %vm420_vm0, %v1026_v42 }
 0x1c7   : > { %v2547_v48 = vld [vmem:[#allocation2 + $0x60] sm:$0xff] }
 0x1c8   : > { %v1098_v52 = vld [vmem:[#allocation2 + $0x61] sm:$0xff] }
 0x1c9   : > { %v1074_v43 = vld [vmem:[#allocation2 + $0x51] sm:$0xff]  ;;  %v2557_v55 = vld [vmem:[#allocation2 + $0x62] sm:$0xff] }
 0x1ca   : > { %v2539_v34 = vld [vmem:[#allocation2 + $0x50] sm:$0xff]  ;;  %v1882_v45 = vpack.i.bf16 %v1074_v43, %v1096_v21  ;;  %v1897_v53 = vpack.i.bf16 %v1098_v52, %v1074_v43 }
 0x1cb   : > { %v1877_v46 = vpack.i.bf16 %v2539_v34, %v2519_v31  ;;  %v2543_v47 = vld [vmem:[#allocation2 + $0x52] sm:$0xff]  ;;  %v1892_v49 = vpack.i.bf16 %v2547_v48, %v2539_v34 }
 0x1cc   : > { %1883 = vrot.lane.b32.xlu0 %v1882_v45, %s1988_s17  ;;  %v1887_v40 = vpack.i.bf16 %v2543_v47, %v2529_v0  ;;  %v1907_v54 = vpack.i.bf16 %v2557_v55, %v2543_v47 }
 0x1cd   : > { %1878 = vrot.lane.b32.xlu1 %v1877_v46, %s1986_s21 }
 0x1d0   : > { %1893 = vrot.lane.b32.xlu0 %v1892_v49, %s1989_s22 }
 0x1d1   : > { %1888 = vrot.lane.b32.xlu1 %v1887_v40, %s1990_s23 }
 0x1d4   : > { %1903 = vrot.lane.b32.xlu0 %v1897_v53, %s1981_s8 }
 0x1d5   : > { %1898 = vrot.lane.b32.xlu1 %v1897_v53, %s1991_s26 }
 0x1d6   : > { %v1774_v57 = vpop.f32.mrf.mxu0 }
 0x1d7   : > { %v1006_v56 = vmul.f32 %v1774_v57, %v2397_v32 }
 0x1d8   : > { %v983_v58 = vpop.f32.mrf.mxu0 }
 0x1d9   : > { %1908 = vrot.lane.b32.xlu1 %v1907_v54, %s1984_s13  ;;  %v1021_v59 = vadd.f32 %v2402_v44, %v1006_v56  ;;  %v1005_v62 = vmul.f32 %v2397_v32, %v983_v58 }
 0x1db   : > { %v1029_v63 = vmax.f32 %v1021_v59, 0.0  ;;  %v1020_v1 = vadd.f32 %v2402_v44, %v1005_v62 }
 0x1dd   : > { %1037 = vst.msk [vmem:[#allocation2 + $0x81] sm:$0xff] %vm420_vm0, %v1029_v63  ;;  %v1028_v2 = vmax.f32 %v1020_v1, 0.0 }
 0x1df   : > { %1036 = vst.msk [vmem:[#allocation2 + $0x71] sm:$0xff] %vm420_vm0, %v1028_v2 }
 0x1e4   : > { %v1077_v14 = vld [vmem:[#allocation2 + $0x81] sm:$0xff] }
 0x1e5   : > { %v1069_v3 = vld [vmem:[#allocation2 + $0x80] sm:$0xff]  ;;  %v1917_v4 = vpack.i.bf16 %v1077_v14, %v2442_v11 }
 0x1e6   : > { %v1912_v6 = vpack.i.bf16 %v1069_v3, %v1062_v51  ;;  %v1076_v7 = vld [vmem:[#allocation2 + $0x71] sm:$0xff]  ;;  %v2584_v10 = vld [vmem:[#allocation2 + $0x82] sm:$0xff] }
 0x1e7   : > { %v2569_v8 = vld [vmem:[#allocation2 + $0x70] sm:$0xff]  ;;  %1918 = vrot.lane.b32.xlu0 %v1917_v4, %s1988_s17  ;;  %v1927_v32 = vpack.i.bf16 %v1076_v7, %v1098_v52  ;;  %v1942_v15 = vpack.i.bf16 %v1077_v14, %v1076_v7  ;;  %v1947_v17 = vpack.i.bf16 %v1076_v7, %v1046_v13  ;;  %v1952_v23 = vpack.i.bf16 %v2584_v10, %v2440_v60 }
 0x1e8   : > { %1913 = vrot.lane.b32.xlu1 %v1912_v6, %s1986_s21  ;;  %v1922_v44 = vpack.i.bf16 %v2569_v8, %v2547_v48  ;;  %v2575_v9 = vld [vmem:[#allocation2 + $0x72] sm:$0xff]  ;;  %v1937_v11 = vpack.i.bf16 %v1069_v3, %v2569_v8 }
 0x1e9   : > { %v1932_v12 = vpack.i.bf16 %v2575_v9, %v2557_v55  ;;  %v1957_v22 = vpack.i.bf16 %v2575_v9, %v1054_v19 }
 0x1eb   : > { %1923 = vrot.lane.b32.xlu0 %v1922_v44, %s1986_s21 }
 0x1ec   : > { %1928 = vrot.lane.b32.xlu1 %v1927_v32, %s1988_s17 }
 0x1ef   : > { %1933 = vrot.lane.b32.xlu0 %v1932_v12, %s1990_s23 }
 0x1f0   : > { %1938 = vrot.lane.b32.xlu1 %v1937_v11, %s1989_s22 }
 0x1f3   : > { %1943 = vrot.lane.b32.xlu0 %v1942_v15, %s1991_s26 }
 0x1f4   : > { %1948 = vrot.lane.b32.xlu1 %v1947_v17, %s1981_s8 }
 0x1f7   : > { %1958 = vrot.lane.b32.xlu0 %v1957_v22, %s1984_s13 }
 0x1f8   : > { %1953 = vrot.lane.b32.xlu1 %v1952_v23, %s1990_s23 }
 0x1fb   : > { %1963 = vrot.lane.b32.xlu0 %v1962_v24, %s1989_s22 }
 0x1fc   : > { %1968 = vrot.lane.b32.xlu1 %v1967_v27, %s1991_s26 }
 0x20a   : > { %v1839_v50 = vpop.permute.xlu1 %1838 }
 0x20b   : > { %v1834_v28 = vpop.permute.xlu0 %1833  ;;  %v1840_v35 = vunpack.i.l.bf16 %v1839_v50  ;;  %v1841_v5 = vunpack.i.h.bf16 %v1839_v50 }
 0x20c   : > { %v1835_v33 = vunpack.i.l.bf16 %v1834_v28  ;;  %v1836_v21 = vunpack.i.h.bf16 %v1834_v28 }
 0x20e   : > { %v1335_v60 = vsel %vm420_vm0, %v1062_v51, %v1835_v33  ;;  %v1336_v30 = vsel %vm420_vm0, %v2500_v16, %v1836_v21 }
 0x20f   : > { %v1343_v29 = vsel %vm808_vm5, %v1335_v60, %v1840_v35  ;;  %v1344_v43 = vsel %vm808_vm5, %v1336_v30, %v1841_v5 }
 0x21f   : > { %v1849_v18 = vpop.permute.xlu1 %1848 }
 0x220   : > { %v1844_v20 = vpop.permute.xlu0 %1843  ;;  %v1850_v25 = vunpack.i.l.bf16 %v1849_v18  ;;  %v1851_v42 = vunpack.i.h.bf16 %v1849_v18 }
 0x221   : > { %v1845_v36 = vunpack.i.l.bf16 %v1844_v20  ;;  %v1846_v61 = vunpack.i.h.bf16 %v1844_v20 }
 0x223   : > { %v1351_v37 = vsel %vm826_vm7, %v1343_v29, %v1845_v36  ;;  %v1859_v38 = vpop.permute.xlu1 %1858  ;;  %v1352_v49 = vsel %vm826_vm7, %v1344_v43, %v1846_v61 }
 0x224   : > { %v1854_v39 = vpop.permute.xlu0 %1853  ;;  %v1860_v45 = vunpack.i.l.bf16 %v1859_v38  ;;  %v1359_v46 = vsel %vm844_vm9, %v1351_v37, %v1850_v25  ;;  %v1861_v57 = vunpack.i.h.bf16 %v1859_v38  ;;  %v1360_v56 = vsel %vm844_vm9, %v1352_v49, %v1851_v42 }
 0x225   : > { %v1855_v41 = vunpack.i.l.bf16 %v1854_v39  ;;  %v1856_v40 = vunpack.i.h.bf16 %v1854_v39 }
 0x227   : > { %v1368_v52 = vsel %vm1366_vm11, %v1359_v46, %v1855_v41  ;;  %v1369_v62 = vsel %vm1366_vm11, %v1360_v56, %v1856_v40  ;;  %v1869_v2 = vpop.permute.xlu1 %1868 }
 0x228   : > { %v1864_v16 = vpop.permute.xlu0 %1863  ;;  %v1377_v54 = vsel %vm1375_vm12, %v1368_v52, %v1860_v45  ;;  %v1378_v63 = vsel %vm1375_vm12, %v1369_v62, %v1861_v57  ;;  %v1870_v51 = vunpack.i.l.bf16 %v1869_v2  ;;  %v1871_v7 = vunpack.i.h.bf16 %v1869_v2 }
 0x229   : > { %v1865_v53 = vunpack.i.l.bf16 %v1864_v16  ;;  %v1866_v58 = vunpack.i.h.bf16 %v1864_v16 }
 0x22a   : > { %v1337_v32 = vsel %vm420_vm0, %v2506_v26, %v1870_v51  ;;  %v1338_v19 = vsel %vm420_vm0, %v2519_v31, %v1871_v7 }
 0x22b   : > { %v1386_v59 = vsel %vm1384_vm13, %v1377_v54, %v1865_v53  ;;  %v1387_v1 = vsel %vm1384_vm13, %v1378_v63, %v1866_v58 }
 0x22c   : > { %1505 = vmatmul.mubr.f32.vlgmr.msra.gmra.mxu1 %v1386_v59  ;;  %v1874_v14 = vpop.permute.xlu0 %1873 }
 0x22d   : > { %1717 = vmatprep.mubr.msk.f32.mxu1 %vm420_vm0, %v2529_v0  ;;  %v1875_v3 = vunpack.i.l.bf16 %v1874_v14  ;;  %v1876_v0 = vunpack.i.h.bf16 %v1874_v14 }
 0x22f   : > { %v1345_v11 = vsel %vm808_vm5, %v1337_v32, %v1875_v3  ;;  %v1346_v23 = vsel %vm808_vm5, %v1338_v19, %v1876_v0  ;;  %v1038_v0 = vld [vmem:[#allocation2] sm:$0xff] }
 0x230   : > { %1510 = vmatmul.mubr.f32.gmra.mxu1 %v1387_v1 }
 0x231   : > { %1718 = vmatprep.mubr.msk.f32.mxu1 %vm420_vm0, %v2543_v47 }
 0x23e   : > { %v1884_v4 = vpop.permute.xlu0 %1883 }
 0x23f   : > { %v1879_v6 = vpop.permute.xlu1 %1878  ;;  %v1885_v12 = vunpack.i.l.bf16 %v1884_v4  ;;  %v1886_v24 = vunpack.i.h.bf16 %v1884_v4 }
 0x240   : > { %v1880_v44 = vunpack.i.l.bf16 %v1879_v6  ;;  %v1881_v13 = vunpack.i.h.bf16 %v1879_v6 }
 0x242   : > { %v1353_v15 = vsel %vm826_vm7, %v1345_v11, %v1880_v44  ;;  %v1894_v17 = vpop.permute.xlu0 %1893  ;;  %v1354_v28 = vsel %vm826_vm7, %v1346_v23, %v1881_v13 }
 0x243   : > { %v1889_v47 = vpop.permute.xlu1 %1888  ;;  %v1895_v27 = vunpack.i.l.bf16 %v1894_v17  ;;  %v1361_v26 = vsel %vm844_vm9, %v1353_v15, %v1885_v12  ;;  %v1896_v60 = vunpack.i.h.bf16 %v1894_v17  ;;  %v1362_v20 = vsel %vm844_vm9, %v1354_v28, %v1886_v24  ;;  %v1109_v28 = vld [vmem:[#allocation2 + $0x92] sm:$0xff] }
 0x244   : > { %v1890_v22 = vunpack.i.l.bf16 %v1889_v47  ;;  %v1891_v50 = vunpack.i.h.bf16 %v1889_v47 }
 0x246   : > { %v1370_v33 = vsel %vm1366_vm11, %v1361_v26, %v1890_v22  ;;  %v1371_v5 = vsel %vm1366_vm11, %v1362_v20, %v1891_v50  ;;  %v1904_v30 = vpop.permute.xlu0 %1903 }
 0x247   : > { %v1899_v35 = vpop.permute.xlu1 %1898  ;;  %v1379_v18 = vsel %vm1375_vm12, %v1370_v33, %v1895_v27  ;;  %v1380_v25 = vsel %vm1375_vm12, %v1371_v5, %v1896_v60  ;;  %v1905_v39 = vunpack.i.l.bf16 %v1904_v30  ;;  %v1906_v42 = vunpack.i.h.bf16 %v1904_v30 }
 0x248   : > { %v1900_v21 = vunpack.i.l.bf16 %v1899_v35  ;;  %v1901_v31 = vunpack.i.h.bf16 %v1899_v35 }
 0x249   : > { %v1340_v53 = vsel %vm420_vm0, %v2547_v48, %v1906_v42 }
 0x24a   : > { %v1388_v36 = vsel %vm1384_vm13, %v1379_v18, %v1900_v21  ;;  %v1389_v29 = vsel %vm1384_vm13, %v1380_v25, %v1901_v31 }
 0x24b   : > { %1515 = vmatmul.mubr.f32.gmra.mxu1 %v1388_v36  ;;  %v1909_v61 = vpop.permute.xlu1 %1908 }
 0x24c   : > { %1719 = vmatprep.mubr.msk.f32.mxu1 %vm420_vm0, %v2557_v55  ;;  %v1910_v41 = vunpack.i.l.bf16 %v1909_v61  ;;  %v1339_v55 = vsel %vm420_vm0, %v2539_v34, %v1905_v39  ;;  %v1911_v46 = vunpack.i.h.bf16 %v1909_v61 }
 0x24e   : > { %v1347_v40 = vsel %vm808_vm5, %v1339_v55, %v1910_v41  ;;  %v1348_v56 = vsel %vm808_vm5, %v1340_v53, %v1911_v46  ;;  %v1724_v46 = vld [vmem:[%s2705_s6] ss:$0 sm:$0xff] }
 0x24f   : > { %1520 = vmatmul.mubr.f32.gmra.mxu1 %v1389_v29 }
 0x250   : > { %1720 = vmatprep.mubr.msk.f32.mxu1 %vm420_vm0, %v2575_v9 }
 0x259   : > { %v2638_v37 = vpop.permute.xlu0 %1918 }
 0x25a   : > { %v1914_v38 = vpop.permute.xlu1 %1913  ;;  %v1921_v17 = vunpack.i.h.bf16 %v2638_v37  ;;  %v1920_v50 = vunpack.i.l.bf16 %v2638_v37 }
 0x25b   : > { %v1916_v47 = vunpack.i.h.bf16 %v1914_v38  ;;  %v1915_v23 = vunpack.i.l.bf16 %v1914_v38 }
 0x25d   : > { %v1924_v45 = vpop.permute.xlu0 %1923 }
 0x25e   : > { %v1929_v43 = vpop.permute.xlu1 %1928  ;;  %v1925_v49 = vunpack.i.l.bf16 %v1924_v45  ;;  %v1926_v16 = vunpack.i.h.bf16 %v1924_v45  ;;  %v1723_v45 = vld [vmem:[%s2704_s5] ss:$0 sm:$0xff] }
 0x25f   : > { %v1930_v52 = vunpack.i.l.bf16 %v1929_v43  ;;  %v1931_v58 = vunpack.i.h.bf16 %v1929_v43 }
 0x260   : > { %v1355_v9 = vsel %vm826_vm7, %v1347_v40, %v1925_v49  ;;  %v1356_v62 = vsel %vm826_vm7, %v1348_v56, %v1926_v16 }
 0x261   : > { %v1934_v54 = vpop.permute.xlu0 %1933  ;;  %v1363_v63 = vsel %vm844_vm9, %v1355_v9, %v1930_v52  ;;  %v1364_v4 = vsel %vm844_vm9, %v1356_v62, %v1931_v58 }
 0x262   : > { %v1939_v57 = vpop.permute.xlu1 %1938  ;;  %v1935_v59 = vunpack.i.l.bf16 %v1934_v54  ;;  %v1936_v1 = vunpack.i.h.bf16 %v1934_v54 }
 0x263   : > { %v1940_v34 = vunpack.i.l.bf16 %v1939_v57  ;;  %v1941_v48 = vunpack.i.h.bf16 %v1939_v57 }
 0x264   : > { %v1372_v2 = vsel %vm1366_vm11, %v1363_v63, %v1935_v59  ;;  %v1373_v12 = vsel %vm1366_vm11, %v1364_v4, %v1936_v1 }
 0x265   : > { %v1944_v14 = vpop.permute.xlu0 %1943  ;;  %v1381_v32 = vsel %vm1375_vm12, %v1372_v2, %v1940_v34  ;;  %v1382_v26 = vsel %vm1375_vm12, %v1373_v12, %v1941_v48 }
 0x266   : > { %v1949_v51 = vpop.permute.xlu1 %1948  ;;  %v1945_v3 = vunpack.i.l.bf16 %v1944_v14  ;;  %v1946_v44 = vunpack.i.h.bf16 %v1944_v14 }
 0x267   : > { %v1951_v6 = vunpack.i.h.bf16 %v1949_v51  ;;  %v1950_v7 = vunpack.i.l.bf16 %v1949_v51 }
 0x268   : > { %v1390_v11 = vsel %vm1384_vm13, %v1381_v32, %v1945_v3  ;;  %v1391_v21 = vsel %vm1384_vm13, %v1382_v26, %v1946_v44 }
 0x269   : > { %1525 = vmatmul.mubr.f32.gmra.mxu1 %v1390_v11  ;;  %v1959_v13 = vpop.permute.xlu0 %1958  ;;  %v1334_v24 = vsel %vm420_vm0, %v1038_v0, %v1950_v7  ;;  %v1341_v27 = vsel %vm420_vm0, %v2569_v8, %v1951_v6 }
 0x26a   : > { %v1954_v15 = vpop.permute.xlu1 %1953  ;;  %v1961_v19 = vunpack.i.h.bf16 %v1959_v13  ;;  %v1960_v22 = vunpack.i.l.bf16 %v1959_v13  ;;  %1721 = vmatprep.mubr.msk.f32.mxu1 %vm420_vm0, %v2584_v10 }
 0x26b   : > { %v1956_v18 = vunpack.i.h.bf16 %v1954_v15  ;;  %v1955_v20 = vunpack.i.l.bf16 %v1954_v15 }
 0x26c   : > { %v1342_v33 = vsel %vm808_vm5, %v1334_v24, %v1960_v22  ;;  %v1349_v35 = vsel %vm808_vm5, %v1341_v27, %v1961_v19 }
 0x26d   : > { %v1350_v60 = vsel %vm826_vm7, %v1342_v33, %v1915_v23  ;;  %v1357_v10 = vsel %vm826_vm7, %v1349_v35, %v1916_v47  ;;  %1530 = vmatmul.mubr.f32.gmra.mxu1 %v1391_v21  ;;  %v1964_v31 = vpop.permute.xlu0 %1963 }
 0x26e   : > { %v1969_v8 = vpop.permute.xlu1 %1968  ;;  %v1358_v36 = vsel %vm844_vm9, %v1350_v60, %v1920_v50  ;;  %v1966_v5 = vunpack.i.h.bf16 %v1964_v31  ;;  %v1965_v25 = vunpack.i.l.bf16 %v1964_v31  ;;  %1722 = vmatprep.mubr.msk.f32.mxu1 %vm420_vm0, %v1109_v28  ;;  %v1365_v37 = vsel %vm844_vm9, %v1357_v10, %v1921_v17 }
 0x26f   : > { %v1971_v29 = vunpack.i.h.bf16 %v1969_v8  ;;  %v1367_v30 = vsel %vm1366_vm11, %v1358_v36, %v1955_v20  ;;  %v1970_v61 = vunpack.i.l.bf16 %v1969_v8  ;;  %v1374_v39 = vsel %vm1366_vm11, %v1365_v37, %v1956_v18 }
 0x270   : > { %v1376_v38 = vsel %vm1375_vm12, %v1367_v30, %v1965_v25  ;;  %v1383_v42 = vsel %vm1375_vm12, %v1374_v39, %v1966_v5 }
 0x271   : > { %v1385_v41 = vsel %vm1384_vm13, %v1376_v38, %v1970_v61  ;;  %v1392_v43 = vsel %vm1384_vm13, %v1383_v42, %v1971_v29 }
 0x272   : > { %1500 = vmatmul.mubr.f32.vlgmr.msra.gmra.mxu0 %v1385_v41  ;;  %1535 = vmatmul.mubr.f32.gmra.mxu1 %v1392_v43 }
 0x2ec   : > { %v1506_v55 = vpop.f32.mrf.mxu1 }
 0x2ed   : > { %v1548_v49 = vmul.f32 %v1723_v45, %v1506_v55 }
 0x2ee   : > { %v1508_v40 = vpop.f32.mrf.mxu1 }
 0x2ef   : > { %v1563_v52 = vadd.f32 %v1724_v46, %v1548_v49 }
 0x2f0   : > { %v1511_v16 = vpop.f32.mrf.mxu1 }
 0x2f1   : > { %v1571_v9 = vmax.f32 %v1563_v52, 0.0  ;;  %v1549_v53 = vmul.f32 %v1723_v45, %v1511_v16 }
 0x2f2   : > { %v1513_v57 = vpop.f32.mrf.mxu1 }
 0x2f3   : > { %1579 = vst [vmem:[%s2686_s30 + $0x8] sm:$0xff] %v1571_v9  ;;  %v1564_v54 = vadd.f32 %v1724_v46, %v1549_v53 }
 0x2f5   : > { %v1572_v56 = vmax.f32 %v1564_v54, 0.0 }
 0x2f7   : > { %1580 = vst [vmem:[%s2686_s30 + $0x10] sm:$0xff] %v1572_v56 }
 0x30b   : > { %v1516_v58 = vpop.f32.mrf.mxu1 }
 0x30c   : > { %v1550_v59 = vmul.f32 %v1723_v45, %v1516_v58 }
 0x30d   : > { %v1518_v62 = vpop.f32.mrf.mxu1 }
 0x30e   : > { %v1565_v34 = vadd.f32 %v1724_v46, %v1550_v59 }
 0x30f   : > { %v1521_v63 = vpop.f32.mrf.mxu1 }
 0x310   : > { %v1573_v1 = vmax.f32 %v1565_v34, 0.0  ;;  %v1551_v2 = vmul.f32 %v1723_v45, %v1521_v63 }
 0x311   : > { %v1523_v14 = vpop.f32.mrf.mxu1 }
 0x312   : > { %1581 = vst [vmem:[%s2686_s30 + $0x18] sm:$0xff] %v1573_v1  ;;  %v1566_v51 = vadd.f32 %v1724_v46, %v1551_v2 }
 0x314   : > { %v1574_v3 = vmax.f32 %v1566_v51, 0.0 }
 0x316   : > { %1582 = vst [vmem:[%s2686_s30 + $0x20] sm:$0xff] %v1574_v3 }
 0x329   : > { %v1526_v4 = vpop.f32.mrf.mxu1 }
 0x32a   : > { %v1552_v48 = vmul.f32 %v1723_v45, %v1526_v4 }
 0x32b   : > { %v1528_v6 = vpop.f32.mrf.mxu1 }
 0x32c   : > { %v1567_v7 = vadd.f32 %v1724_v46, %v1552_v48 }
 0x32d   : > { %v1531_v32 = vpop.f32.mrf.mxu1 }
 0x32e   : > { %v1575_v44 = vmax.f32 %v1567_v7, 0.0  ;;  %v1553_v0 = vmul.f32 %v1723_v45, %v1531_v32 }
 0x32f   : > { %v1533_v11 = vpop.f32.mrf.mxu1 }
 0x330   : > { %1583 = vst [vmem:[%s2686_s30 + $0x28] sm:$0xff] %v1575_v44  ;;  %v1568_v12 = vadd.f32 %v1724_v46, %v1553_v0 }
 0x332   : > { %v1576_v13 = vmax.f32 %v1568_v12, 0.0  ;;  %v1501_v15 = vpop.f32.mrf.mxu0  ;;  %v1536_v47 = vpop.f32.mrf.mxu1 }
 0x333   : > { %v1547_v17 = vmul.f32 %v1723_v45, %v1501_v15  ;;  %v1554_v19 = vmul.f32 %v1723_v45, %v1536_v47 }
 0x334   : > { %1584 = vst [vmem:[%s2686_s30 + $0x30] sm:$0xff] %v1576_v13  ;;  %v1503_v22 = vpop.f32.mrf.mxu0  ;;  %v1538_v24 = vpop.f32.mrf.mxu1 }
 0x335   : > { %v1562_v23 = vadd.f32 %v1724_v46, %v1547_v17  ;;  %v1569_v27 = vadd.f32 %v1724_v46, %v1554_v19 }
 0x337   : > { %v1570_v26 = vmax.f32 %v1562_v23, 0.0  ;;  %v1577_v28 = vmax.f32 %v1569_v27, 0.0 }
 0x339   : > { %1578 = vst [vmem:[%s2686_s30] sm:$0xff] %v1570_v26  ;;  %1585 = vst [vmem:[%s2686_s30 + $0x38] sm:$0xff] %v1577_v28 }
 0x33a PF: > { %s17_s24 = sadd.s32 1, %s1978_s24  }
 0x33b   : > { %p14_p4 = scmp.ge.s32.totalorder %s17_s24, 4  }
 0x33d   :  { %16 = sbr.rel (!%p14_p4) target bundleno = 1 (0x1), region = 86 }

</bundles_post_ra>
